<compile_context>
chip_gen: v7x
topology: tpu7x:2x2x1
jax: 0.10.0
libtpu: 0.0.40
codegen_flags: <defaults>
</compile_context>

<pallas_src>
import functools

import jax
import jax.numpy as jnp
from jax.experimental import pallas as pl
from jax.experimental.pallas import tpu as pltpu

BN_EPS = 1e-5
LANE = 128
HALF = 64   # lane offset where logvar / y live inside packed 128-lane slabs


def _pad_up(n, m=LANE):
    return ((int(n) + m - 1) // m) * m


# ----------------------------- kernel helpers -----------------------------
def _linear_bf16(h, w_ref, b_ref):
    # bf16 MXU matmul with f32 accumulation; bias add stays in f32.
    return jnp.dot(h.astype(jnp.bfloat16), w_ref[...],
                   preferred_element_type=jnp.float32) + b_ref[...]


def _relu(h):
    return jnp.maximum(h, 0.0)


def _bn_train(h, g_ref, b_ref, inv_b):
    # PyTorch training-mode BN: batch mean, biased batch variance, all in f32.
    mean = jnp.sum(h, axis=0, keepdims=True) * inv_b
    d = h - mean
    var = jnp.sum(d * d, axis=0, keepdims=True) * inv_b
    return d * jax.lax.rsqrt(var + BN_EPS) * g_ref[...] + b_ref[...]


# --------------------------------- kernel ---------------------------------
def _make_kernel(forward_dim, inv_b):
    def kernel(
        # inputs
        y_ref, xy_ref, eps_ref,
        # forward_net
        fw_w1, fw_b1, fw_g1, fw_be1,
        fw_w2, fw_b2, fw_g2, fw_be2,
        fw_w3, fw_b3, fw_w4, fw_b4,
        # encoder (first layer acts on compact cat(x, y))
        en_w1, en_b1, en_g, en_be, en_w2, en_b2,
        # fused mu|logvar head (one 128-lane tile)
        hd_w, hd_b,
        # decoder (first layer acts on packed z|y slab)
        de_w1, de_b1, de_g1, de_be1,
        de_w2, de_b2, de_g2, de_be2,
        de_w3, de_b3,
        # outputs (lane-dense, padded)
        recon_ref, head_ref, xhat_ref,
    ):
        y_shift = y_ref[...]  # (B,128) f32, y at lanes [HALF:HALF+forward_dim]

        # ---- x_hat = forward_net(y) ----
        # L1: only forward_dim real input features -> broadcast-FMA on the VPU
        # (weight stored compactly as (pad8(fd), 128) f32), skipping the MXU.
        h = fw_b1[...]
        for k in range(forward_dim):
            h = h + y_shift[:, HALF + k:HALF + k + 1] * fw_w1[k:k + 1, :]
        h = _relu(h)
        h = _bn_train(h, fw_g1, fw_be1, inv_b)
        h = _relu(_linear_bf16(h, fw_w2, fw_b2))
        h = _bn_train(h, fw_g2, fw_be2, inv_b)
        h = _relu(_linear_bf16(h, fw_w3, fw_b3))
        xhat_ref[...] = _linear_bf16(h, fw_w4, fw_b4)

        # ---- h = encoder(cat(x, y)) : compact-K fused matmul ----
        h = _relu(_linear_bf16(xy_ref[...], en_w1, en_b1))
        h = _bn_train(h, en_g, en_be, inv_b)
        h = _relu(_linear_bf16(h, en_w2, en_b2))

        # ---- fused mu|logvar head packed in ONE 128-lane tile ----
        # lanes [0:latent] = mu, lanes [HALF:HALF+latent] = logvar.
        head = _linear_bf16(h, hd_w, hd_b)            # (B, 128)
        head_ref[...] = head

        lane = jax.lax.broadcasted_iota(jnp.int32, (1, LANE), 1)
        mu_only = jnp.where(lane < HALF, head, 0.0)   # zero the logvar half
        logvar_sh = pltpu.roll(head, HALF, axis=1)    # logvar now at lanes [0:latent]
        # eps is zero outside [0:latent], so stray rolled lanes contribute nothing.
        z = mu_only + eps_ref[...] * jnp.exp(0.5 * logvar_sh)

        # ---- recon_x = decoder(cat(z, y)) : packed 128-lane z|y slab ----
        zy = z + y_shift                              # z @ [0:latent], y @ [HALF:HALF+fd]
        h = _relu(_linear_bf16(zy, de_w1, de_b1))
        h = _bn_train(h, de_g1, de_be1, inv_b)
        h = _relu(_linear_bf16(h, de_w2, de_b2))
        h = _bn_train(h, de_g2, de_be2, inv_b)
        recon_ref[...] = _linear_bf16(h, de_w3, de_b3)

    return kernel


# -------------------------- params (real + padded) --------------------------
PARAM_ORDER = (
    "fw_w1", "fw_b1", "fw_g1", "fw_be1",
    "fw_w2", "fw_b2", "fw_g2", "fw_be2",
    "fw_w3", "fw_b3", "fw_w4", "fw_b4",
    "en_w1", "en_b1", "en_g", "en_be", "en_w2", "en_b2",
    "hd_w", "hd_b",
    "de_w1", "de_b1", "de_g1", "de_be1",
    "de_w2", "de_b2", "de_g2", "de_be2",
    "de_w3", "de_b3",
)


def init_params(input_size, latent_dim, hidden_dim=256, forward_dim=3, seed=0):
    """Deterministic synthetic init at the *real* (unpadded) PyTorch shapes."""
    keys = iter(jax.random.split(jax.random.PRNGKey(seed), 64))

    def w(shape, scale=0.05):
        return (scale * jax.random.normal(next(keys), shape)).astype(jnp.float32)

    def b(n, scale=0.01):
        return (scale * jax.random.normal(next(keys), (1, n))).astype(jnp.float32)

    def gamma(n):
        return jnp.ones((1, n), jnp.float32)

    def beta(n):
        return jnp.zeros((1, n), jnp.float32)

    p = {}
    # forward_net: Linear(fd,64) ReLU BN Linear(64,64) ReLU BN Linear(64,64) ReLU Linear(64,in)
    p["fw_w1"], p["fw_b1"] = w((forward_dim, 64)), b(64)
    p["fw_g1"], p["fw_be1"] = gamma(64), beta(64)
    p["fw_w2"], p["fw_b2"] = w((64, 64)), b(64)
    p["fw_g2"], p["fw_be2"] = gamma(64), beta(64)
    p["fw_w3"], p["fw_b3"] = w((64, 64)), b(64)
    p["fw_w4"], p["fw_b4"] = w((64, input_size)), b(input_size)
    # encoder: Linear(in+fd,H) ReLU BN Linear(H,H) ReLU
    p["en_w1"], p["en_b1"] = w((input_size + forward_dim, hidden_dim)), b(hidden_dim)
    p["en_g"], p["en_be"] = gamma(hidden_dim), beta(hidden_dim)
    p["en_w2"], p["en_b2"] = w((hidden_dim, hidden_dim)), b(hidden_dim)
    # heads
    p["mu_w"], p["mu_b"] = w((hidden_dim, latent_dim)), b(latent_dim)
    p["lv_w"], p["lv_b"] = w((hidden_dim, latent_dim)), b(latent_dim)
    # decoder: Linear(L+fd,H) ReLU BN Linear(H,H) ReLU BN Linear(H,in)
    p["de_w1"], p["de_b1"] = w((latent_dim + forward_dim, hidden_dim)), b(hidden_dim)
    p["de_g1"], p["de_be1"] = gamma(hidden_dim), beta(hidden_dim)
    p["de_w2"], p["de_b2"] = w((hidden_dim, hidden_dim)), b(hidden_dim)
    p["de_g2"], p["de_be2"] = gamma(hidden_dim), beta(hidden_dim)
    p["de_w3"], p["de_b3"] = w((hidden_dim, input_size)), b(input_size)
    return p


def pad_params(rp, input_size, latent_dim, hidden_dim, forward_dim):
    """Zero-pad / repack parameters into the kernel's compact bf16 layouts."""
    assert latent_dim <= HALF, "packed head / z|y slab assumes latent_dim <= 64"
    assert forward_dim <= HALF, "packed z|y slab assumes forward_dim <= 64"

    in_p = _pad_up(input_size)
    hid_p = _pad_up(hidden_dim)
    h64_p = _pad_up(64)
    fw_rows = _pad_up(forward_dim, 8)
    xy_c = _pad_up(input_size + forward_dim, 32)

    def pw(a, rows, cols, dtype=jnp.bfloat16):
        out = jnp.zeros((rows, cols), jnp.float32).at[: a.shape[0], : a.shape[1]].set(a)
        return out.astype(dtype)

    def pv(a, cols):
        return jnp.zeros((1, cols), jnp.float32).at[:, : a.shape[-1]].set(a.reshape(1, -1))

    pp = {}
    # forward_net L1 weight stays f32 (used as VPU broadcast-FMA rows).
    pp["fw_w1"], pp["fw_b1"] = pw(rp["fw_w1"], fw_rows, h64_p, dtype=jnp.float32), pv(rp["fw_b1"], h64_p)
    pp["fw_g1"], pp["fw_be1"] = pv(rp["fw_g1"], h64_p), pv(rp["fw_be1"], h64_p)
    pp["fw_w2"], pp["fw_b2"] = pw(rp["fw_w2"], h64_p, h64_p), pv(rp["fw_b2"], h64_p)
    pp["fw_g2"], pp["fw_be2"] = pv(rp["fw_g2"], h64_p), pv(rp["fw_be2"], h64_p)
    pp["fw_w3"], pp["fw_b3"] = pw(rp["fw_w3"], h64_p, h64_p), pv(rp["fw_b3"], h64_p)
    pp["fw_w4"], pp["fw_b4"] = pw(rp["fw_w4"], h64_p, in_p), pv(rp["fw_b4"], in_p)

    pp["en_w1"], pp["en_b1"] = pw(rp["en_w1"], xy_c, hid_p), pv(rp["en_b1"], hid_p)
    pp["en_g"], pp["en_be"] = pv(rp["en_g"], hid_p), pv(rp["en_be"], hid_p)
    pp["en_w2"], pp["en_b2"] = pw(rp["en_w2"], hid_p, hid_p), pv(rp["en_b2"], hid_p)

    # Fused head packed in ONE 128-lane tile: mu @ [0:latent], logvar @ [HALF:HALF+latent].
    hd_w = jnp.zeros((hid_p, LANE), jnp.float32)
    hd_w = hd_w.at[:hidden_dim, :latent_dim].set(rp["mu_w"])
    hd_w = hd_w.at[:hidden_dim, HALF:HALF + latent_dim].set(rp["lv_w"])
    pp["hd_w"] = hd_w.astype(jnp.bfloat16)
    hd_b = jnp.zeros((1, LANE), jnp.float32)
    hd_b = hd_b.at[:, :latent_dim].set(rp["mu_b"])
    hd_b = hd_b.at[:, HALF:HALF + latent_dim].set(rp["lv_b"])
    pp["hd_b"] = hd_b

    # Decoder L1 weight laid out for the packed zy slab: z rows @ [0:latent], y rows @ [HALF:].
    de_w1 = jnp.zeros((LANE, hid_p), jnp.float32)
    de_w1 = de_w1.at[:latent_dim, :hidden_dim].set(rp["de_w1"][:latent_dim])
    de_w1 = de_w1.at[HALF:HALF + forward_dim, :hidden_dim].set(rp["de_w1"][latent_dim:])
    pp["de_w1"], pp["de_b1"] = de_w1.astype(jnp.bfloat16), pv(rp["de_b1"], hid_p)
    pp["de_g1"], pp["de_be1"] = pv(rp["de_g1"], hid_p), pv(rp["de_be1"], hid_p)
    pp["de_w2"], pp["de_b2"] = pw(rp["de_w2"], hid_p, hid_p), pv(rp["de_b2"], hid_p)
    pp["de_g2"], pp["de_be2"] = pv(rp["de_g2"], hid_p), pv(rp["de_be2"], hid_p)
    pp["de_w3"], pp["de_b3"] = pw(rp["de_w3"], hid_p, in_p), pv(rp["de_b3"], in_p)
    return pp


# --------------------------------- wrapper ---------------------------------
@functools.partial(jax.jit, static_argnames=("input_size", "latent_dim", "forward_dim"))
def cvae_gsnn_forward(x, y, eps, padded_params, *, input_size, latent_dim, forward_dim):
    """Returns (recon_x, mu, logvar, x_hat) — same as cVAE_GSNN.forward(x, y)."""
    B = x.shape[0]
    in_p = _pad_up(input_size)
    xy_c = _pad_up(input_size + forward_dim, 32)

    # Lane packing / the cat(x, y) concat happen in XLA, fused into this jit.
    y_shift = jnp.zeros((B, LANE), jnp.float32).at[:, HALF:HALF + forward_dim].set(y)
    xy_pad = jnp.zeros((B, xy_c), jnp.float32).at[
        :, : input_size + forward_dim].set(jnp.concatenate([x, y], axis=1))
    eps_pad = jnp.zeros((B, LANE), jnp.float32).at[:, :latent_dim].set(eps)

    flat = [padded_params[k] for k in PARAM_ORDER]

    # Advisory cost hint: at small B the kernel is HBM/latency bound.
    param_bytes = sum(int(a.size) * a.dtype.itemsize for a in flat)
    io_bytes = (sum(int(a.size) * a.dtype.itemsize for a in (y_shift, xy_pad, eps_pad))
                + 4 * B * (2 * in_p + LANE))
    flops = 2 * B * (8 * LANE * LANE + xy_c * LANE)
    cost = pl.CostEstimate(flops=flops, transcendentals=2 * B * LANE,
                           bytes_accessed=param_bytes + io_bytes)

    vmem = pl.BlockSpec(memory_space=pltpu.MemorySpace.VMEM)
    out_shape = (
        jax.ShapeDtypeStruct((B, in_p), jnp.float32),   # recon_x (lane-padded)
        jax.ShapeDtypeStruct((B, LANE), jnp.float32),   # packed mu|logvar
        jax.ShapeDtypeStruct((B, in_p), jnp.float32),   # x_hat (lane-padded)
    )
    # TODO(synk): on v6e/v7x fuse the independent forward_net / encoder prologue layers into
    #             256-lane block-diagonal matmuls (MXU pass is 256^2 there); keep 128-lane on v5e.
    # TODO(synk): for production batch sizes add a row-tiled batch grid
    #             (dimension_semantics=("parallel",), constant weight index_maps so weights stay
    #             resident) with a cross-block BatchNorm statistics pass, sizing the batch tile
    #             against v7x's 64 MiB VMEM; at B=8 a single lane-dense invocation is fastest.
    recon_p, head_p, xhat_p = pl.pallas_call(
        _make_kernel(forward_dim, 1.0 / B),
        out_shape=out_shape,
        in_specs=[vmem] * (3 + len(flat)),
        out_specs=(vmem,) * 3,
        cost_estimate=cost,
    )(y_shift, xy_pad, eps_pad, *flat)

    recon_x = recon_p[:, :input_size]
    mu = head_p[:, :latent_dim]
    logvar = head_p[:, HALF:HALF + latent_dim]
    x_hat = xhat_p[:, :input_size]
    return recon_x, mu, logvar, x_hat


# --------------------------- pure-JAX reference -----------------------------
def reference_forward(x, y, eps, rp):
    def lin(h, w, b):
        return h @ w + b

    def bn(h, g, be):
        m = jnp.mean(h, axis=0, keepdims=True)
        v = jnp.mean((h - m) ** 2, axis=0, keepdims=True)
        return (h - m) / jnp.sqrt(v + BN_EPS) * g + be

    relu = lambda h: jnp.maximum(h, 0.0)

    h = relu(lin(y, rp["fw_w1"], rp["fw_b1"])); h = bn(h, rp["fw_g1"], rp["fw_be1"])
    h = relu(lin(h, rp["fw_w2"], rp["fw_b2"])); h = bn(h, rp["fw_g2"], rp["fw_be2"])
    h = relu(lin(h, rp["fw_w3"], rp["fw_b3"])); x_hat = lin(h, rp["fw_w4"], rp["fw_b4"])

    h = relu(lin(jnp.concatenate([x, y], axis=1), rp["en_w1"], rp["en_b1"]))
    h = bn(h, rp["en_g"], rp["en_be"])
    h = relu(lin(h, rp["en_w2"], rp["en_b2"]))

    mu = lin(h, rp["mu_w"], rp["mu_b"])
    logvar = lin(h, rp["lv_w"], rp["lv_b"])
    z = mu + eps * jnp.exp(0.5 * logvar)

    h = relu(lin(jnp.concatenate([z, y], axis=1), rp["de_w1"], rp["de_b1"]))
    h = bn(h, rp["de_g1"], rp["de_be1"])
    h = relu(lin(h, rp["de_w2"], rp["de_b2"])); h = bn(h, rp["de_g2"], rp["de_be2"])
    recon_x = lin(h, rp["de_w3"], rp["de_b3"])
    return recon_x, mu, logvar, x_hat


# ----------------------------------- main ----------------------------------
if __name__ == "__main__":
    B = 8
    INPUT_SIZE = 16
    LATENT_DIM = 4
    HIDDEN_DIM = 32
    FORWARD_DIM = 3

    key = jax.random.PRNGKey(0)
    kx, ky, keps = jax.random.split(key, 3)
    x = jax.random.normal(kx, (B, INPUT_SIZE), dtype=jnp.float32)
    y = jax.random.normal(ky, (B, FORWARD_DIM), dtype=jnp.float32)
    eps = jax.random.normal(keps, (B, LATENT_DIM), dtype=jnp.float32)  # reparam noise

    real_params = init_params(INPUT_SIZE, LATENT_DIM, HIDDEN_DIM, FORWARD_DIM, seed=0)
    padded_params = pad_params(real_params, INPUT_SIZE, LATENT_DIM, HIDDEN_DIM, FORWARD_DIM)

    recon_x, mu, logvar, x_hat = cvae_gsnn_forward(
        x, y, eps, padded_params,
        input_size=INPUT_SIZE, latent_dim=LATENT_DIM, forward_dim=FORWARD_DIM)
    jax.block_until_ready((recon_x, mu, logvar, x_hat))

    # Validate the packed/bf16 layout against an unpadded f32 pure-JAX reference.
    r_ref, mu_ref, lv_ref, xh_ref = reference_forward(x, y, eps, real_params)
    for got, want in ((recon_x, r_ref), (mu, mu_ref), (logvar, lv_ref), (x_hat, xh_ref)):
        assert got.shape == want.shape, (got.shape, want.shape)
        assert bool(jnp.all(jnp.isfinite(got)))
        assert bool(jnp.allclose(got, want, atol=5e-2, rtol=5e-2)), \
            float(jnp.max(jnp.abs(got - want)))

    print("KERNEL_OK")
</pallas_src>

<mosaic_0001>
module attributes {stable_mosaic.version = 11 : i64} {
  func.func @kernel(%arg0: memref<8x128xf32, #tpu.memory_space<vmem>>, %arg1: memref<8x32xf32, #tpu.memory_space<vmem>>, %arg2: memref<8x128xf32, #tpu.memory_space<vmem>>, %arg3: memref<8x128xf32, #tpu.memory_space<vmem>>, %arg4: memref<1x128xf32, #tpu.memory_space<vmem>>, %arg5: memref<1x128xf32, #tpu.memory_space<vmem>>, %arg6: memref<1x128xf32, #tpu.memory_space<vmem>>, %arg7: memref<128x128xbf16, #tpu.memory_space<vmem>>, %arg8: memref<1x128xf32, #tpu.memory_space<vmem>>, %arg9: memref<1x128xf32, #tpu.memory_space<vmem>>, %arg10: memref<1x128xf32, #tpu.memory_space<vmem>>, %arg11: memref<128x128xbf16, #tpu.memory_space<vmem>>, %arg12: memref<1x128xf32, #tpu.memory_space<vmem>>, %arg13: memref<128x128xbf16, #tpu.memory_space<vmem>>, %arg14: memref<1x128xf32, #tpu.memory_space<vmem>>, %arg15: memref<32x128xbf16, #tpu.memory_space<vmem>>, %arg16: memref<1x128xf32, #tpu.memory_space<vmem>>, %arg17: memref<1x128xf32, #tpu.memory_space<vmem>>, %arg18: memref<1x128xf32, #tpu.memory_space<vmem>>, %arg19: memref<128x128xbf16, #tpu.memory_space<vmem>>, %arg20: memref<1x128xf32, #tpu.memory_space<vmem>>, %arg21: memref<128x128xbf16, #tpu.memory_space<vmem>>, %arg22: memref<1x128xf32, #tpu.memory_space<vmem>>, %arg23: memref<128x128xbf16, #tpu.memory_space<vmem>>, %arg24: memref<1x128xf32, #tpu.memory_space<vmem>>, %arg25: memref<1x128xf32, #tpu.memory_space<vmem>>, %arg26: memref<1x128xf32, #tpu.memory_space<vmem>>, %arg27: memref<128x128xbf16, #tpu.memory_space<vmem>>, %arg28: memref<1x128xf32, #tpu.memory_space<vmem>>, %arg29: memref<1x128xf32, #tpu.memory_space<vmem>>, %arg30: memref<1x128xf32, #tpu.memory_space<vmem>>, %arg31: memref<128x128xbf16, #tpu.memory_space<vmem>>, %arg32: memref<1x128xf32, #tpu.memory_space<vmem>>, %arg33: memref<8x128xf32, #tpu.memory_space<vmem>>, %arg34: memref<8x128xf32, #tpu.memory_space<vmem>>, %arg35: memref<8x128xf32, #tpu.memory_space<vmem>>) attributes {dimension_semantics = [], scalar_prefetch = 0 : i64, scratch_operands = 0 : i64, tpu.core_type = #tpu.core_type<tc>} {
    %c0 = arith.constant 0 : index
    %c0_0 = arith.constant 0 : index
    %0 = vector.load %arg0[%c0, %c0_0] : memref<8x128xf32, #tpu.memory_space<vmem>>, vector<8x128xf32>
    %c0_1 = arith.constant 0 : index
    %c0_2 = arith.constant 0 : index
    %1 = vector.load %arg4[%c0_1, %c0_2] : memref<1x128xf32, #tpu.memory_space<vmem>>, vector<1x128xf32>
    %2 = vector.extract_strided_slice %0 {offsets = [0, 64], sizes = [8, 1], strides = [1, 1]} : vector<8x128xf32> to vector<8x1xf32>
    %c0_3 = arith.constant 0 : index
    %c0_4 = arith.constant 0 : index
    %3 = vector.load %arg3[%c0_3, %c0_4] : memref<8x128xf32, #tpu.memory_space<vmem>>, vector<1x128xf32>
    %4 = vector.broadcast %2 : vector<8x1xf32> to vector<8x128xf32>
    %5 = vector.broadcast %3 : vector<1x128xf32> to vector<8x128xf32>
    %6 = arith.mulf %4, %5 : vector<8x128xf32>
    %7 = vector.broadcast %1 : vector<1x128xf32> to vector<8x128xf32>
    %8 = arith.addf %7, %6 : vector<8x128xf32>
    %9 = vector.extract_strided_slice %0 {offsets = [0, 65], sizes = [8, 1], strides = [1, 1]} : vector<8x128xf32> to vector<8x1xf32>
    %c1 = arith.constant 1 : index
    %c0_5 = arith.constant 0 : index
    %10 = vector.load %arg3[%c1, %c0_5] : memref<8x128xf32, #tpu.memory_space<vmem>>, vector<1x128xf32>
    %11 = vector.broadcast %9 : vector<8x1xf32> to vector<8x128xf32>
    %12 = vector.broadcast %10 : vector<1x128xf32> to vector<8x128xf32>
    %13 = arith.mulf %11, %12 : vector<8x128xf32>
    %14 = arith.addf %8, %13 : vector<8x128xf32>
    %15 = vector.extract_strided_slice %0 {offsets = [0, 66], sizes = [8, 1], strides = [1, 1]} : vector<8x128xf32> to vector<8x1xf32>
    %c2 = arith.constant 2 : index
    %c0_6 = arith.constant 0 : index
    %16 = vector.load %arg3[%c2, %c0_6] : memref<8x128xf32, #tpu.memory_space<vmem>>, vector<1x128xf32>
    %17 = vector.broadcast %15 : vector<8x1xf32> to vector<8x128xf32>
    %18 = vector.broadcast %16 : vector<1x128xf32> to vector<8x128xf32>
    %19 = arith.mulf %17, %18 : vector<8x128xf32>
    %20 = arith.addf %14, %19 : vector<8x128xf32>
    %cst = arith.constant 0.000000e+00 : f32
    %21 = vector.broadcast %cst : f32 to vector<8x128xf32>
    %22 = arith.maximumf %20, %21 : vector<8x128xf32>
    %cst_7 = arith.constant dense<0.000000e+00> : vector<128xf32>
    %23 = vector.multi_reduction <add>, %22, %cst_7 [0] : vector<8x128xf32> to vector<128xf32>
    %24 = vector.shape_cast %23 : vector<128xf32> to vector<1x128xf32>
    %cst_8 = arith.constant 1.250000e-01 : f32
    %25 = vector.broadcast %cst_8 : f32 to vector<1x128xf32>
    %26 = arith.mulf %24, %25 : vector<1x128xf32>
    %27 = vector.broadcast %26 : vector<1x128xf32> to vector<8x128xf32>
    %28 = arith.subf %22, %27 : vector<8x128xf32>
    %29 = arith.mulf %28, %28 : vector<8x128xf32>
    %cst_9 = arith.constant dense<0.000000e+00> : vector<128xf32>
    %30 = vector.multi_reduction <add>, %29, %cst_9 [0] : vector<8x128xf32> to vector<128xf32>
    %31 = vector.shape_cast %30 : vector<128xf32> to vector<1x128xf32>
    %cst_10 = arith.constant 1.250000e-01 : f32
    %32 = vector.broadcast %cst_10 : f32 to vector<1x128xf32>
    %33 = arith.mulf %31, %32 : vector<1x128xf32>
    %cst_11 = arith.constant 9.99999974E-6 : f32
    %34 = vector.broadcast %cst_11 : f32 to vector<1x128xf32>
    %35 = arith.addf %33, %34 : vector<1x128xf32>
    %36 = math.rsqrt %35 : vector<1x128xf32>
    %37 = vector.broadcast %36 : vector<1x128xf32> to vector<8x128xf32>
    %38 = arith.mulf %28, %37 : vector<8x128xf32>
    %c0_12 = arith.constant 0 : index
    %c0_13 = arith.constant 0 : index
    %39 = vector.load %arg5[%c0_12, %c0_13] : memref<1x128xf32, #tpu.memory_space<vmem>>, vector<1x128xf32>
    %40 = vector.broadcast %39 : vector<1x128xf32> to vector<8x128xf32>
    %41 = arith.mulf %38, %40 : vector<8x128xf32>
    %c0_14 = arith.constant 0 : index
    %c0_15 = arith.constant 0 : index
    %42 = vector.load %arg6[%c0_14, %c0_15] : memref<1x128xf32, #tpu.memory_space<vmem>>, vector<1x128xf32>
    %43 = vector.broadcast %42 : vector<1x128xf32> to vector<8x128xf32>
    %44 = arith.addf %41, %43 : vector<8x128xf32>
    %45 = arith.truncf %44 : vector<8x128xf32> to vector<8x128xbf16>
    %c0_16 = arith.constant 0 : index
    %c0_17 = arith.constant 0 : index
    %46 = vector.load %arg7[%c0_16, %c0_17] : memref<128x128xbf16, #tpu.memory_space<vmem>>, vector<128x128xbf16>
    %cst_18 = arith.constant dense<0.000000e+00> : vector<8x128xf32>
    %47 = tpu.matmul %45, %46, %cst_18 {dimension_numbers = #tpu.dot_dimension_numbers<[1], [0], [0], [1], [0, 0, 1, 1], [], []>} : vector<8x128xbf16>, vector<128x128xbf16>, vector<8x128xf32> -> vector<8x128xf32>
    %c0_19 = arith.constant 0 : index
    %c0_20 = arith.constant 0 : index
    %48 = vector.load %arg8[%c0_19, %c0_20] : memref<1x128xf32, #tpu.memory_space<vmem>>, vector<1x128xf32>
    %49 = vector.broadcast %48 : vector<1x128xf32> to vector<8x128xf32>
    %50 = arith.addf %47, %49 : vector<8x128xf32>
    %cst_21 = arith.constant 0.000000e+00 : f32
    %51 = vector.broadcast %cst_21 : f32 to vector<8x128xf32>
    %52 = arith.maximumf %50, %51 : vector<8x128xf32>
    %cst_22 = arith.constant dense<0.000000e+00> : vector<128xf32>
    %53 = vector.multi_reduction <add>, %52, %cst_22 [0] : vector<8x128xf32> to vector<128xf32>
    %54 = vector.shape_cast %53 : vector<128xf32> to vector<1x128xf32>
    %cst_23 = arith.constant 1.250000e-01 : f32
    %55 = vector.broadcast %cst_23 : f32 to vector<1x128xf32>
    %56 = arith.mulf %54, %55 : vector<1x128xf32>
    %57 = vector.broadcast %56 : vector<1x128xf32> to vector<8x128xf32>
    %58 = arith.subf %52, %57 : vector<8x128xf32>
    %59 = arith.mulf %58, %58 : vector<8x128xf32>
    %cst_24 = arith.constant dense<0.000000e+00> : vector<128xf32>
    %60 = vector.multi_reduction <add>, %59, %cst_24 [0] : vector<8x128xf32> to vector<128xf32>
    %61 = vector.shape_cast %60 : vector<128xf32> to vector<1x128xf32>
    %cst_25 = arith.constant 1.250000e-01 : f32
    %62 = vector.broadcast %cst_25 : f32 to vector<1x128xf32>
    %63 = arith.mulf %61, %62 : vector<1x128xf32>
    %cst_26 = arith.constant 9.99999974E-6 : f32
    %64 = vector.broadcast %cst_26 : f32 to vector<1x128xf32>
    %65 = arith.addf %63, %64 : vector<1x128xf32>
    %66 = math.rsqrt %65 : vector<1x128xf32>
    %67 = vector.broadcast %66 : vector<1x128xf32> to vector<8x128xf32>
    %68 = arith.mulf %58, %67 : vector<8x128xf32>
    %c0_27 = arith.constant 0 : index
    %c0_28 = arith.constant 0 : index
    %69 = vector.load %arg9[%c0_27, %c0_28] : memref<1x128xf32, #tpu.memory_space<vmem>>, vector<1x128xf32>
    %70 = vector.broadcast %69 : vector<1x128xf32> to vector<8x128xf32>
    %71 = arith.mulf %68, %70 : vector<8x128xf32>
    %c0_29 = arith.constant 0 : index
    %c0_30 = arith.constant 0 : index
    %72 = vector.load %arg10[%c0_29, %c0_30] : memref<1x128xf32, #tpu.memory_space<vmem>>, vector<1x128xf32>
    %73 = vector.broadcast %72 : vector<1x128xf32> to vector<8x128xf32>
    %74 = arith.addf %71, %73 : vector<8x128xf32>
    %75 = arith.truncf %74 : vector<8x128xf32> to vector<8x128xbf16>
    %c0_31 = arith.constant 0 : index
    %c0_32 = arith.constant 0 : index
    %76 = vector.load %arg11[%c0_31, %c0_32] : memref<128x128xbf16, #tpu.memory_space<vmem>>, vector<128x128xbf16>
    %cst_33 = arith.constant dense<0.000000e+00> : vector<8x128xf32>
    %77 = tpu.matmul %75, %76, %cst_33 {dimension_numbers = #tpu.dot_dimension_numbers<[1], [0], [0], [1], [0, 0, 1, 1], [], []>} : vector<8x128xbf16>, vector<128x128xbf16>, vector<8x128xf32> -> vector<8x128xf32>
    %c0_34 = arith.constant 0 : index
    %c0_35 = arith.constant 0 : index
    %78 = vector.load %arg12[%c0_34, %c0_35] : memref<1x128xf32, #tpu.memory_space<vmem>>, vector<1x128xf32>
    %79 = vector.broadcast %78 : vector<1x128xf32> to vector<8x128xf32>
    %80 = arith.addf %77, %79 : vector<8x128xf32>
    %cst_36 = arith.constant 0.000000e+00 : f32
    %81 = vector.broadcast %cst_36 : f32 to vector<8x128xf32>
    %82 = arith.maximumf %80, %81 : vector<8x128xf32>
    %83 = arith.truncf %82 : vector<8x128xf32> to vector<8x128xbf16>
    %c0_37 = arith.constant 0 : index
    %c0_38 = arith.constant 0 : index
    %84 = vector.load %arg13[%c0_37, %c0_38] : memref<128x128xbf16, #tpu.memory_space<vmem>>, vector<128x128xbf16>
    %cst_39 = arith.constant dense<0.000000e+00> : vector<8x128xf32>
    %85 = tpu.matmul %83, %84, %cst_39 {dimension_numbers = #tpu.dot_dimension_numbers<[1], [0], [0], [1], [0, 0, 1, 1], [], []>} : vector<8x128xbf16>, vector<128x128xbf16>, vector<8x128xf32> -> vector<8x128xf32>
    %c0_40 = arith.constant 0 : index
    %c0_41 = arith.constant 0 : index
    %86 = vector.load %arg14[%c0_40, %c0_41] : memref<1x128xf32, #tpu.memory_space<vmem>>, vector<1x128xf32>
    %87 = vector.broadcast %86 : vector<1x128xf32> to vector<8x128xf32>
    %88 = arith.addf %85, %87 : vector<8x128xf32>
    %c0_42 = arith.constant 0 : index
    %c0_43 = arith.constant 0 : index
    %89 = vector.load %arg35[%c0_42, %c0_43] : memref<8x128xf32, #tpu.memory_space<vmem>>, vector<8x128xf32>
    tpu.vector_store %arg35[%c0_42, %c0_43], %88 {strides = array<i32>} : memref<8x128xf32, #tpu.memory_space<vmem>>, vector<8x128xf32>,
    %c0_44 = arith.constant 0 : index
    %c0_45 = arith.constant 0 : index
    %90 = vector.load %arg1[%c0_44, %c0_45] : memref<8x32xf32, #tpu.memory_space<vmem>>, vector<8x32xf32>
    %91 = arith.truncf %90 : vector<8x32xf32> to vector<8x32xbf16>
    %c0_46 = arith.constant 0 : index
    %c0_47 = arith.constant 0 : index
    %92 = vector.load %arg15[%c0_46, %c0_47] : memref<32x128xbf16, #tpu.memory_space<vmem>>, vector<32x128xbf16>
    %cst_48 = arith.constant dense<0.000000e+00> : vector<8x128xf32>
    %93 = tpu.matmul %91, %92, %cst_48 {dimension_numbers = #tpu.dot_dimension_numbers<[1], [0], [0], [1], [0, 0, 1, 1], [], []>} : vector<8x32xbf16>, vector<32x128xbf16>, vector<8x128xf32> -> vector<8x128xf32>
    %c0_49 = arith.constant 0 : index
    %c0_50 = arith.constant 0 : index
    %94 = vector.load %arg16[%c0_49, %c0_50] : memref<1x128xf32, #tpu.memory_space<vmem>>, vector<1x128xf32>
    %95 = vector.broadcast %94 : vector<1x128xf32> to vector<8x128xf32>
    %96 = arith.addf %93, %95 : vector<8x128xf32>
    %cst_51 = arith.constant 0.000000e+00 : f32
    %97 = vector.broadcast %cst_51 : f32 to vector<8x128xf32>
    %98 = arith.maximumf %96, %97 : vector<8x128xf32>
    %cst_52 = arith.constant dense<0.000000e+00> : vector<128xf32>
    %99 = vector.multi_reduction <add>, %98, %cst_52 [0] : vector<8x128xf32> to vector<128xf32>
    %100 = vector.shape_cast %99 : vector<128xf32> to vector<1x128xf32>
    %cst_53 = arith.constant 1.250000e-01 : f32
    %101 = vector.broadcast %cst_53 : f32 to vector<1x128xf32>
    %102 = arith.mulf %100, %101 : vector<1x128xf32>
    %103 = vector.broadcast %102 : vector<1x128xf32> to vector<8x128xf32>
    %104 = arith.subf %98, %103 : vector<8x128xf32>
    %105 = arith.mulf %104, %104 : vector<8x128xf32>
    %cst_54 = arith.constant dense<0.000000e+00> : vector<128xf32>
    %106 = vector.multi_reduction <add>, %105, %cst_54 [0] : vector<8x128xf32> to vector<128xf32>
    %107 = vector.shape_cast %106 : vector<128xf32> to vector<1x128xf32>
    %cst_55 = arith.constant 1.250000e-01 : f32
    %108 = vector.broadcast %cst_55 : f32 to vector<1x128xf32>
    %109 = arith.mulf %107, %108 : vector<1x128xf32>
    %cst_56 = arith.constant 9.99999974E-6 : f32
    %110 = vector.broadcast %cst_56 : f32 to vector<1x128xf32>
    %111 = arith.addf %109, %110 : vector<1x128xf32>
    %112 = math.rsqrt %111 : vector<1x128xf32>
    %113 = vector.broadcast %112 : vector<1x128xf32> to vector<8x128xf32>
    %114 = arith.mulf %104, %113 : vector<8x128xf32>
    %c0_57 = arith.constant 0 : index
    %c0_58 = arith.constant 0 : index
    %115 = vector.load %arg17[%c0_57, %c0_58] : memref<1x128xf32, #tpu.memory_space<vmem>>, vector<1x128xf32>
    %116 = vector.broadcast %115 : vector<1x128xf32> to vector<8x128xf32>
    %117 = arith.mulf %114, %116 : vector<8x128xf32>
    %c0_59 = arith.constant 0 : index
    %c0_60 = arith.constant 0 : index
    %118 = vector.load %arg18[%c0_59, %c0_60] : memref<1x128xf32, #tpu.memory_space<vmem>>, vector<1x128xf32>
    %119 = vector.broadcast %118 : vector<1x128xf32> to vector<8x128xf32>
    %120 = arith.addf %117, %119 : vector<8x128xf32>
    %121 = arith.truncf %120 : vector<8x128xf32> to vector<8x128xbf16>
    %c0_61 = arith.constant 0 : index
    %c0_62 = arith.constant 0 : index
    %122 = vector.load %arg19[%c0_61, %c0_62] : memref<128x128xbf16, #tpu.memory_space<vmem>>, vector<128x128xbf16>
    %cst_63 = arith.constant dense<0.000000e+00> : vector<8x128xf32>
    %123 = tpu.matmul %121, %122, %cst_63 {dimension_numbers = #tpu.dot_dimension_numbers<[1], [0], [0], [1], [0, 0, 1, 1], [], []>} : vector<8x128xbf16>, vector<128x128xbf16>, vector<8x128xf32> -> vector<8x128xf32>
    %c0_64 = arith.constant 0 : index
    %c0_65 = arith.constant 0 : index
    %124 = vector.load %arg20[%c0_64, %c0_65] : memref<1x128xf32, #tpu.memory_space<vmem>>, vector<1x128xf32>
    %125 = vector.broadcast %124 : vector<1x128xf32> to vector<8x128xf32>
    %126 = arith.addf %123, %125 : vector<8x128xf32>
    %cst_66 = arith.constant 0.000000e+00 : f32
    %127 = vector.broadcast %cst_66 : f32 to vector<8x128xf32>
    %128 = arith.maximumf %126, %127 : vector<8x128xf32>
    %129 = arith.truncf %128 : vector<8x128xf32> to vector<8x128xbf16>
    %c0_67 = arith.constant 0 : index
    %c0_68 = arith.constant 0 : index
    %130 = vector.load %arg21[%c0_67, %c0_68] : memref<128x128xbf16, #tpu.memory_space<vmem>>, vector<128x128xbf16>
    %cst_69 = arith.constant dense<0.000000e+00> : vector<8x128xf32>
    %131 = tpu.matmul %129, %130, %cst_69 {dimension_numbers = #tpu.dot_dimension_numbers<[1], [0], [0], [1], [0, 0, 1, 1], [], []>} : vector<8x128xbf16>, vector<128x128xbf16>, vector<8x128xf32> -> vector<8x128xf32>
    %c0_70 = arith.constant 0 : index
    %c0_71 = arith.constant 0 : index
    %132 = vector.load %arg22[%c0_70, %c0_71] : memref<1x128xf32, #tpu.memory_space<vmem>>, vector<1x128xf32>
    %133 = vector.broadcast %132 : vector<1x128xf32> to vector<8x128xf32>
    %134 = arith.addf %131, %133 : vector<8x128xf32>
    %c0_72 = arith.constant 0 : index
    %c0_73 = arith.constant 0 : index
    %135 = vector.load %arg34[%c0_72, %c0_73] : memref<8x128xf32, #tpu.memory_space<vmem>>, vector<8x128xf32>
    tpu.vector_store %arg34[%c0_72, %c0_73], %134 {strides = array<i32>} : memref<8x128xf32, #tpu.memory_space<vmem>>, vector<8x128xf32>,
    %136 = tpu.iota {dimensions = array<i32: 1>} : vector<1x128xi32>
    %c64_i32 = arith.constant 64 : i32
    %137 = vector.broadcast %c64_i32 : i32 to vector<1x128xi32>
    %138 = arith.cmpi slt, %136, %137 : vector<1x128xi32>
    %cst_74 = arith.constant 0.000000e+00 : f32
    %139 = vector.shape_cast %138 : vector<1x128xi1> to vector<1x128xi1>
    %140 = vector.broadcast %139 : vector<1x128xi1> to vector<8x128xi1>
    %141 = vector.broadcast %cst_74 : f32 to vector<8x128xf32>
    %142 = arith.select %140, %134, %141 : vector<8x128xi1>, vector<8x128xf32>
    %c64_i32_75 = arith.constant 64 : i32
    %143 = tpu.dynamic_rotate %134 by %c64_i32_75 dim 1 : vector<8x128xf32>, i32 -> vector<8x128xf32>
    %c0_76 = arith.constant 0 : index
    %c0_77 = arith.constant 0 : index
    %144 = vector.load %arg2[%c0_76, %c0_77] : memref<8x128xf32, #tpu.memory_space<vmem>>, vector<8x128xf32>
    %cst_78 = arith.constant 5.000000e-01 : f32
    %145 = vector.broadcast %cst_78 : f32 to vector<8x128xf32>
    %146 = arith.mulf %145, %143 : vector<8x128xf32>
    %147 = math.exp %146 : vector<8x128xf32>
    %148 = arith.mulf %144, %147 : vector<8x128xf32>
    %149 = arith.addf %142, %148 : vector<8x128xf32>
    %150 = arith.addf %149, %0 : vector<8x128xf32>
    %151 = arith.truncf %150 : vector<8x128xf32> to vector<8x128xbf16>
    %c0_79 = arith.constant 0 : index
    %c0_80 = arith.constant 0 : index
    %152 = vector.load %arg23[%c0_79, %c0_80] : memref<128x128xbf16, #tpu.memory_space<vmem>>, vector<128x128xbf16>
    %cst_81 = arith.constant dense<0.000000e+00> : vector<8x128xf32>
    %153 = tpu.matmul %151, %152, %cst_81 {dimension_numbers = #tpu.dot_dimension_numbers<[1], [0], [0], [1], [0, 0, 1, 1], [], []>} : vector<8x128xbf16>, vector<128x128xbf16>, vector<8x128xf32> -> vector<8x128xf32>
    %c0_82 = arith.constant 0 : index
    %c0_83 = arith.constant 0 : index
    %154 = vector.load %arg24[%c0_82, %c0_83] : memref<1x128xf32, #tpu.memory_space<vmem>>, vector<1x128xf32>
    %155 = vector.broadcast %154 : vector<1x128xf32> to vector<8x128xf32>
    %156 = arith.addf %153, %155 : vector<8x128xf32>
    %cst_84 = arith.constant 0.000000e+00 : f32
    %157 = vector.broadcast %cst_84 : f32 to vector<8x128xf32>
    %158 = arith.maximumf %156, %157 : vector<8x128xf32>
    %cst_85 = arith.constant dense<0.000000e+00> : vector<128xf32>
    %159 = vector.multi_reduction <add>, %158, %cst_85 [0] : vector<8x128xf32> to vector<128xf32>
    %160 = vector.shape_cast %159 : vector<128xf32> to vector<1x128xf32>
    %cst_86 = arith.constant 1.250000e-01 : f32
    %161 = vector.broadcast %cst_86 : f32 to vector<1x128xf32>
    %162 = arith.mulf %160, %161 : vector<1x128xf32>
    %163 = vector.broadcast %162 : vector<1x128xf32> to vector<8x128xf32>
    %164 = arith.subf %158, %163 : vector<8x128xf32>
    %165 = arith.mulf %164, %164 : vector<8x128xf32>
    %cst_87 = arith.constant dense<0.000000e+00> : vector<128xf32>
    %166 = vector.multi_reduction <add>, %165, %cst_87 [0] : vector<8x128xf32> to vector<128xf32>
    %167 = vector.shape_cast %166 : vector<128xf32> to vector<1x128xf32>
    %cst_88 = arith.constant 1.250000e-01 : f32
    %168 = vector.broadcast %cst_88 : f32 to vector<1x128xf32>
    %169 = arith.mulf %167, %168 : vector<1x128xf32>
    %cst_89 = arith.constant 9.99999974E-6 : f32
    %170 = vector.broadcast %cst_89 : f32 to vector<1x128xf32>
    %171 = arith.addf %169, %170 : vector<1x128xf32>
    %172 = math.rsqrt %171 : vector<1x128xf32>
    %173 = vector.broadcast %172 : vector<1x128xf32> to vector<8x128xf32>
    %174 = arith.mulf %164, %173 : vector<8x128xf32>
    %c0_90 = arith.constant 0 : index
    %c0_91 = arith.constant 0 : index
    %175 = vector.load %arg25[%c0_90, %c0_91] : memref<1x128xf32, #tpu.memory_space<vmem>>, vector<1x128xf32>
    %176 = vector.broadcast %175 : vector<1x128xf32> to vector<8x128xf32>
    %177 = arith.mulf %174, %176 : vector<8x128xf32>
    %c0_92 = arith.constant 0 : index
    %c0_93 = arith.constant 0 : index
    %178 = vector.load %arg26[%c0_92, %c0_93] : memref<1x128xf32, #tpu.memory_space<vmem>>, vector<1x128xf32>
    %179 = vector.broadcast %178 : vector<1x128xf32> to vector<8x128xf32>
    %180 = arith.addf %177, %179 : vector<8x128xf32>
    %181 = arith.truncf %180 : vector<8x128xf32> to vector<8x128xbf16>
    %c0_94 = arith.constant 0 : index
    %c0_95 = arith.constant 0 : index
    %182 = vector.load %arg27[%c0_94, %c0_95] : memref<128x128xbf16, #tpu.memory_space<vmem>>, vector<128x128xbf16>
    %cst_96 = arith.constant dense<0.000000e+00> : vector<8x128xf32>
    %183 = tpu.matmul %181, %182, %cst_96 {dimension_numbers = #tpu.dot_dimension_numbers<[1], [0], [0], [1], [0, 0, 1, 1], [], []>} : vector<8x128xbf16>, vector<128x128xbf16>, vector<8x128xf32> -> vector<8x128xf32>
    %c0_97 = arith.constant 0 : index
    %c0_98 = arith.constant 0 : index
    %184 = vector.load %arg28[%c0_97, %c0_98] : memref<1x128xf32, #tpu.memory_space<vmem>>, vector<1x128xf32>
    %185 = vector.broadcast %184 : vector<1x128xf32> to vector<8x128xf32>
    %186 = arith.addf %183, %185 : vector<8x128xf32>
    %cst_99 = arith.constant 0.000000e+00 : f32
    %187 = vector.broadcast %cst_99 : f32 to vector<8x128xf32>
    %188 = arith.maximumf %186, %187 : vector<8x128xf32>
    %cst_100 = arith.constant dense<0.000000e+00> : vector<128xf32>
    %189 = vector.multi_reduction <add>, %188, %cst_100 [0] : vector<8x128xf32> to vector<128xf32>
    %190 = vector.shape_cast %189 : vector<128xf32> to vector<1x128xf32>
    %cst_101 = arith.constant 1.250000e-01 : f32
    %191 = vector.broadcast %cst_101 : f32 to vector<1x128xf32>
    %192 = arith.mulf %190, %191 : vector<1x128xf32>
    %193 = vector.broadcast %192 : vector<1x128xf32> to vector<8x128xf32>
    %194 = arith.subf %188, %193 : vector<8x128xf32>
    %195 = arith.mulf %194, %194 : vector<8x128xf32>
    %cst_102 = arith.constant dense<0.000000e+00> : vector<128xf32>
    %196 = vector.multi_reduction <add>, %195, %cst_102 [0] : vector<8x128xf32> to vector<128xf32>
    %197 = vector.shape_cast %196 : vector<128xf32> to vector<1x128xf32>
    %cst_103 = arith.constant 1.250000e-01 : f32
    %198 = vector.broadcast %cst_103 : f32 to vector<1x128xf32>
    %199 = arith.mulf %197, %198 : vector<1x128xf32>
    %cst_104 = arith.constant 9.99999974E-6 : f32
    %200 = vector.broadcast %cst_104 : f32 to vector<1x128xf32>
    %201 = arith.addf %199, %200 : vector<1x128xf32>
    %202 = math.rsqrt %201 : vector<1x128xf32>
    %203 = vector.broadcast %202 : vector<1x128xf32> to vector<8x128xf32>
    %204 = arith.mulf %194, %203 : vector<8x128xf32>
    %c0_105 = arith.constant 0 : index
    %c0_106 = arith.constant 0 : index
    %205 = vector.load %arg29[%c0_105, %c0_106] : memref<1x128xf32, #tpu.memory_space<vmem>>, vector<1x128xf32>
    %206 = vector.broadcast %205 : vector<1x128xf32> to vector<8x128xf32>
    %207 = arith.mulf %204, %206 : vector<8x128xf32>
    %c0_107 = arith.constant 0 : index
    %c0_108 = arith.constant 0 : index
    %208 = vector.load %arg30[%c0_107, %c0_108] : memref<1x128xf32, #tpu.memory_space<vmem>>, vector<1x128xf32>
    %209 = vector.broadcast %208 : vector<1x128xf32> to vector<8x128xf32>
    %210 = arith.addf %207, %209 : vector<8x128xf32>
    %211 = arith.truncf %210 : vector<8x128xf32> to vector<8x128xbf16>
    %c0_109 = arith.constant 0 : index
    %c0_110 = arith.constant 0 : index
    %212 = vector.load %arg31[%c0_109, %c0_110] : memref<128x128xbf16, #tpu.memory_space<vmem>>, vector<128x128xbf16>
    %cst_111 = arith.constant dense<0.000000e+00> : vector<8x128xf32>
    %213 = tpu.matmul %211, %212, %cst_111 {dimension_numbers = #tpu.dot_dimension_numbers<[1], [0], [0], [1], [0, 0, 1, 1], [], []>} : vector<8x128xbf16>, vector<128x128xbf16>, vector<8x128xf32> -> vector<8x128xf32>
    %c0_112 = arith.constant 0 : index
    %c0_113 = arith.constant 0 : index
    %214 = vector.load %arg32[%c0_112, %c0_113] : memref<1x128xf32, #tpu.memory_space<vmem>>, vector<1x128xf32>
    %215 = vector.broadcast %214 : vector<1x128xf32> to vector<8x128xf32>
    %216 = arith.addf %213, %215 : vector<8x128xf32>
    %c0_114 = arith.constant 0 : index
    %c0_115 = arith.constant 0 : index
    %217 = vector.load %arg33[%c0_114, %c0_115] : memref<8x128xf32, #tpu.memory_space<vmem>>, vector<8x128xf32>
    tpu.vector_store %arg33[%c0_114, %c0_115], %216 {strides = array<i32>} : memref<8x128xf32, #tpu.memory_space<vmem>>, vector<8x128xf32>,
    return
  }
}

</mosaic_0001>

<bundles_post_ra>
// kernel: cvae_gsnn_forward.1
= control target key start
LH: loop header
LB: loop body
LE: loop exit
PB: predicated region body
PF: predicated region fallthrough
CT: control target
= control target key end

     0   :  { %s2767_s6 = smov 1   ;;  %s2768_s10 = smov 2   ;;  %s3278_s0 = inlined_call_operand.smem [shape: u32[36], index: -1, kind: input, shape index: {}] }
   0x1   :  { %s2842_s5 = sld [smem:[%s3278_s0]]   ;;  %s2769_s14 = smov 3  }
   0x2   :  { %s2847_s9 = sld [smem:[%s3278_s0 + %s2767_s6]]   ;;  %s2770_s18 = smov 4  }
   0x3   :  { %s2852_s13 = sld [smem:[%s3278_s0 + %s2768_s10]]   ;;  %s2771_s22 = smov 5  }
   0x4   :  { %s2857_s17 = sld [smem:[%s3278_s0 + %s2769_s14]]   ;;  %s2772_s26 = smov 6  }
   0x5   :  { %s2862_s21 = sld [smem:[%s3278_s0 + %s2770_s18]]   ;;  %s2773_s30 = smov 7  }
   0x6   :  { %s2867_s25 = sld [smem:[%s3278_s0 + %s2771_s22]]   ;;  %s2774_s4 = smov 8  }
   0x7   :  { %3291 = sst [smem:[#allocation55_spill]] %s2842_s5  ;;  %s2775_s10 = smov 9  }
   0x8   :  { %3292 = sst [smem:[#allocation56_spill]] %s2847_s9  ;;  %s2776_s15 = smov 10  }
   0x9   :  { %3293 = sst [smem:[#allocation57_spill]] %s2852_s13  ;;  %s2777_s20 = smov 11  }
   0xa   :  { %s2872_s29 = sld [smem:[%s3278_s0 + %s2772_s26]]   ;;  %s2778_s26 = smov 12  }
   0xb   :  { %3294 = sst [smem:[#allocation58_spill]] %s2862_s21  ;;  %s2779_s1 = smov 13  }
   0xc   :  { %3295 = sst [smem:[#allocation59_spill]] %s2867_s25  ;;  %s2780_s7 = smov 14  }
   0xd   :  { %s2877_s3 = sld [smem:[%s3278_s0 + %s2773_s30]]   ;;  %s2782_s22 = smov 16  }
   0xe   :  { %s2882_s8 = sld [smem:[%s3278_s0 + %s2774_s4]]   ;;  %s2783_s28 = smov 17  }
   0xf   :  { %s2887_s14 = sld [smem:[%s3278_s0 + %s2775_s10]]  }
  0x10   :  { %s2892_s19 = sld [smem:[%s3278_s0 + %s2776_s15]]   ;;  %s2781_s15 = smov 15  }
  0x11   :  { %s2897_s24 = sld [smem:[%s3278_s0 + %s2777_s20]]  }
  0x12   :  { %s2902_s30 = sld [smem:[%s3278_s0 + %s2778_s26]]  }
  0x13   :  { %3296 = sst [smem:[#allocation60_spill]] %s2877_s3 }
  0x14   :  { %s2907_s6 = sld [smem:[%s3278_s0 + %s2779_s1]]  }
  0x15   :  { %s2912_s12 = sld [smem:[%s3278_s0 + %s2780_s7]]   ;;  %s2784_s7 = smov 18  }
  0x16   :  { %s2917_s20 = sld [smem:[%s3278_s0 + %s2781_s15]]   ;;  %s2785_s15 = smov 19  }
  0x17   :  { %3297 = sst [smem:[#allocation61_spill]] %s2897_s24 }
  0x18   :  { %s2922_s27 = sld [smem:[%s3278_s0 + %s2782_s22]]   ;;  %s2786_s22 = smov 20  }
  0x19   :  { %s2927_s4 = sld [smem:[%s3278_s0 + %s2783_s28]]   ;;  %s2787_s28 = smov 21  }
  0x1a   :  { %3298 = sst [smem:[#allocation62_spill]] %s2907_s6 }
  0x1b   :  { %3299 = sst [smem:[#allocation63_spill]] %s2912_s12 }
  0x1c   :  { %s2932_s13 = sld [smem:[%s3278_s0 + %s2784_s7]]   ;;  %s2788_s7 = smov 22  }
  0x1d   :  { %s2937_s9 = sld [smem:[%s3278_s0 + %s2785_s15]]   ;;  %s2789_s15 = smov 23  }
  0x1e   :  { %3300 = sst [smem:[#allocation64_spill]] %s2922_s27 }
  0x1f   :  { %s2942_s6 = sld [smem:[%s3278_s0 + %s2786_s22]]   ;;  %s2790_s22 = smov 24  }
  0x20   :  { %s2947_s24 = sld [smem:[%s3278_s0 + %s2787_s28]]   ;;  %s2791_s28 = smov 25  }
  0x21   :  { %s2952_s25 = sld [smem:[%s3278_s0 + %s2788_s7]]   ;;  %s2792_s7 = smov 26  }
  0x22   :  { %3301 = sst [smem:[#allocation65_spill]] %s2932_s13 }
  0x23   :  { %s2957_s21 = sld [smem:[%s3278_s0 + %s2789_s15]]   ;;  %s2793_s15 = smov 27  }
  0x24   :  { %s2962_s3 = sld [smem:[%s3278_s0 + %s2790_s22]]   ;;  %s2794_s22 = smov 28  }
  0x25   :  { %3302 = sst [smem:[#allocation66_spill]] %s2942_s6 }
  0x26   :  { %3303 = sst [smem:[#allocation67_spill]] %s2947_s24 }
  0x27   :  { %3304 = sst [smem:[#allocation68_spill]] %s2952_s25 }
  0x28   :  { %s2967_s24 = sld [smem:[%s3278_s0 + %s2791_s28]]   ;;  %s2795_s28 = smov 29  }
  0x29   :  { %s2972_s25 = sld [smem:[%s3278_s0 + %s2792_s7]]   ;;  %s2796_s7 = smov 30  }
  0x2a   :  { %3305 = sst [smem:[#allocation69_spill]] %s2962_s3 }
  0x2b   :  { %s2977_s5 = sld [smem:[%s3278_s0 + %s2793_s15]]   ;;  %s2797_s15 = smov 31  }
  0x2c   :  { %s2982_s3 = sld [smem:[%s3278_s0 + %s2794_s22]]   ;;  %s2798_s22 = smov 32  }
  0x2d   :  { %s2987_s6 = sld [smem:[%s3278_s0 + %s2795_s28]]   ;;  %s2799_s28 = smov 33  }
  0x2e   :  { %s2997_s13 = sld [smem:[%s3278_s0 + %s2797_s15]]   ;;  %s2801_s15 = smov 35  }
  0x2f   :  { %3306 = sst [smem:[#allocation70_spill]] %s2972_s25 }
  0x30   :  { %s2992_s25 = sld [smem:[%s3278_s0 + %s2796_s7]]   ;;  %s2800_s7 = smov 34  }
  0x31   :  { %s3007_s27 = sld [smem:[%s3278_s0 + %s2799_s28]]  }
  0x32   :  { %3307 = sst [smem:[#allocation71_spill]] %s2982_s3 }
  0x33   :  { %s3002_s3 = sld [smem:[%s3278_s0 + %s2798_s22]]  }
  0x34   :  { %s3017_s12 = sld [smem:[%s3278_s0 + %s2801_s15]]  }
  0x36   :  { %3308 = sst [smem:[#allocation72_spill]] %s2992_s25 }
  0x37   :  { %s3012_s25 = sld [smem:[%s3278_s0 + %s2800_s7]]  }
  0x38   :  { %77 = vsyncpa [#allocation3], 0 }
  0x39   :  { %78 = vsyncpa [#allocation6], 0 }
  0x3a   :  { %79 = vsyncpa [#allocation9], 0 }
  0x3b   :  { %80 = vsyncpa [#allocation12], 0 }
  0x3c   :  { %81 = vsyncpa [#allocation15], 0 }
  0x3d   :  { %82 = vsyncpa [#allocation18], 0 }
  0x3e   :  { %83 = vsyncpa [#allocation21], 0 }
  0x3f   :  { %84 = vsyncpa [#allocation24], 0 }
  0x40   :  { %85 = vsyncpa [#allocation27], 0 }
  0x41   :  { %86 = vsyncpa [#allocation30], 0 }
  0x42   :  { %87 = vsyncpa [#allocation33], 0 }
  0x43   :  { %88 = vsyncpa [#allocation36], 0 }
  0x44   :  { %89 = vsyncpa [#allocation4], 0 }
  0x45   :  { %90 = vsyncpa [#allocation40], 0  ;;  %s2802_s22 = smov [#allocation5]   ;;  %s2803_s23 = smov [#allocation8]  }
  0x46   :  { %s117_s0 = sshll.u32 %s2802_s22, 4  ;;  %s139_s26 = sshll.u32 %s2803_s23, 4  ;;  %s118_s0 = int_to_ptr.vmem [resolvable:$true] %s117_s0  ;;  %s140_s26 = int_to_ptr.vmem [resolvable:$true] %s139_s26 }
  0x47   :  { %s2189_s28 = scalar_lea.hbm %s2872_s29, 16 }
  0x48   :  { %p2190_p0 = scmp.ne.s32.totalorder %s2872_s29, %s2189_s28  ;;  %p2193_p1 = scmp.lt.u32.totalorder %s2189_s28, %s2872_s29 }
  0x4a   :  { %p2195_p2 = pnand %p2193_p1, %p2190_p0 }
  0x4c   :  { %2198 = shalt.err (!%p2195_p2)
}
  0x4d   :  { %s2199_s1 = scalar_lea.vmem %s118_s0, 16  ;;  %s2203_s2 = scalar_lea.vmem %s118_s0, 32 }
  0x4e   :  { %p2200_p3 = scmp.ne.s32.totalorder %s118_s0, %s2199_s1  ;;  %p2204_p4 = scmp.lt.s32.totalorder %s118_s0, %s118_s0 }
  0x4f   :  { %p2205_p5 = scmp.lt.s32.totalorder %s2203_s2, %s2199_s1 }
  0x51   :  { %p2206_p6 = por %p2205_p5, %p2204_p4 }
  0x53   :  { %p2207_p7 = pnand %p2206_p6, %p2200_p3 }
  0x55   :  { %2210 = shalt.err (!%p2207_p7)
}
  0x56   :  { %120 = dma.hbm_to_vmem [thread:$0]  %s2872_s29, 16, %s118_s0, [#allocation6]  }
  0x57   :  { %s2211_s7 = scalar_lea.hbm %s2887_s14, 16 }
  0x58   :  { %p2212_p8 = scmp.ne.s32.totalorder %s2887_s14, %s2211_s7  ;;  %p2215_p9 = scmp.lt.u32.totalorder %s2211_s7, %s2887_s14 }
  0x5a   :  { %p2217_p10 = pnand %p2215_p9, %p2212_p8 }
  0x5c   :  { %2220 = shalt.err (!%p2217_p10)
}
  0x5d   :  { %s2221_s10 = scalar_lea.vmem %s140_s26, 16  ;;  %s2225_s11 = scalar_lea.vmem %s140_s26, 32 }
  0x5e   :  { %p2222_p11 = scmp.ne.s32.totalorder %s140_s26, %s2221_s10  ;;  %p2226_p12 = scmp.lt.s32.totalorder %s140_s26, %s140_s26 }
  0x5f   :  { %p2227_p13 = scmp.lt.s32.totalorder %s2225_s11, %s2221_s10 }
  0x61   :  { %p2228_p0 = por %p2227_p13, %p2226_p12 }
  0x63   :  { %p2229_p1 = pnand %p2228_p0, %p2222_p11 }
  0x65   :  { %2232 = shalt.err (!%p2229_p1)
}
  0x66   :  { %142 = dma.hbm_to_vmem [thread:$0]  %s2887_s14, 16, %s140_s26, [#allocation9]  }
  0x67   :  { %s2804_s15 = smov [#allocation11]   ;;  %s2805_s16 = smov [#allocation14]  }
  0x68   :  { %s161_s29 = sshll.u32 %s2804_s15, 4  ;;  %s182_s18 = sshll.u32 %s2805_s16, 4  ;;  %s162_s29 = int_to_ptr.vmem [resolvable:$true] %s161_s29  ;;  %s3027_s18 = int_to_ptr.vmem [resolvable:$true] %s182_s18 }
  0x69   :  { %s2233_s22 = scalar_lea.hbm %s2902_s30, 16 }
  0x6a   :  { %p2234_p2 = scmp.ne.s32.totalorder %s2902_s30, %s2233_s22  ;;  %p2237_p3 = scmp.lt.u32.totalorder %s2233_s22, %s2902_s30 }
  0x6c   :  { %p2239_p4 = pnand %p2237_p3, %p2234_p2 }
  0x6e   :  { %2242 = shalt.err (!%p2239_p4)
}
  0x6f   :  { %s2243_s0 = scalar_lea.vmem %s162_s29, 16  ;;  %s2247_s23 = scalar_lea.vmem %s162_s29, 32 }
  0x70   :  { %p2244_p5 = scmp.ne.s32.totalorder %s162_s29, %s2243_s0  ;;  %p2248_p6 = scmp.lt.s32.totalorder %s162_s29, %s162_s29 }
  0x71   :  { %p2249_p7 = scmp.lt.s32.totalorder %s2247_s23, %s2243_s0 }
  0x73   :  { %p2250_p8 = por %p2249_p7, %p2248_p6 }
  0x75   :  { %p2251_p9 = pnand %p2250_p8, %p2244_p5 }
  0x77   :  { %2254 = shalt.err (!%p2251_p9)
}
  0x78   :  { %164 = dma.hbm_to_vmem [thread:$0]  %s2902_s30, 16, %s162_s29, [#allocation12]  }
  0x79   :  { %s2255_s14 = scalar_lea.hbm %s2917_s20, 256 }
  0x7a   :  { %p2256_p10 = scmp.ne.s32.totalorder %s2917_s20, %s2255_s14  ;;  %p2259_p11 = scmp.lt.u32.totalorder %s2255_s14, %s2917_s20 }
  0x7c   :  { %p2261_p12 = pnand %p2259_p11, %p2256_p10 }
  0x7e   :  { %2264 = shalt.err (!%p2261_p12)
}
  0x7f   :  { %s2265_s26 = scalar_lea.vmem %s3027_s18, 256  ;;  %p2270_p0 = scmp.lt.s32.totalorder %s3027_s18, %s3027_s18 }
  0x80   :  { %p2266_p13 = scmp.ne.s32.totalorder %s3027_s18, %s2265_s26  ;;  %p2271_p1 = scmp.lt.s32.totalorder %s2265_s26, %s2265_s26 }
  0x82   :  { %p2272_p2 = por %p2271_p1, %p2270_p0 }
  0x84   :  { %p2273_p3 = pnand %p2272_p2, %p2266_p13 }
  0x86   :  { %2276 = shalt.err (!%p2273_p3)
}
  0x87   :  { %s2806_s28 = smov 64   ;;  %s2807_s30 = smov 4  }
  0x88   :  { %188 = dma.hbm_to_vmem [thread:$0]  %s2917_s20, 256, %s3027_s18, [#allocation15], %s2806_s28, %s2806_s28, %s2807_s30  }
  0x89   :  { %s2808_s1 = smov [#allocation17]   ;;  %s2809_s7 = smov [#allocation20]  }
  0x8a   :  { %s205_s2 = sshll.u32 %s2808_s1, 4  ;;  %s224_s10 = sshll.u32 %s2809_s7, 4  ;;  %s206_s2 = int_to_ptr.vmem [resolvable:$true] %s205_s2  ;;  %s3045_s10 = int_to_ptr.vmem [resolvable:$true] %s224_s10 }
  0x8b   :  { %s2277_s11 = scalar_lea.hbm %s2927_s4, 16 }
  0x8c   :  { %p2278_p4 = scmp.ne.s32.totalorder %s2927_s4, %s2277_s11  ;;  %p2281_p5 = scmp.lt.u32.totalorder %s2277_s11, %s2927_s4 }
  0x8e   :  { %p2283_p6 = pnand %p2281_p5, %p2278_p4 }
  0x90   :  { %2286 = shalt.err (!%p2283_p6)
}
  0x91   :  { %s2287_s15 = scalar_lea.vmem %s206_s2, 16  ;;  %s2291_s29 = scalar_lea.vmem %s206_s2, 32 }
  0x92   :  { %p2288_p7 = scmp.ne.s32.totalorder %s206_s2, %s2287_s15  ;;  %p2292_p8 = scmp.lt.s32.totalorder %s206_s2, %s206_s2 }
  0x93   :  { %p2293_p9 = scmp.lt.s32.totalorder %s2291_s29, %s2287_s15 }
  0x95   :  { %p2294_p10 = por %p2293_p9, %p2292_p8 }
  0x97   :  { %p2295_p11 = pnand %p2294_p10, %p2288_p7 }
  0x99   :  { %2298 = shalt.err (!%p2295_p11)
}
  0x9a   :  { %208 = dma.hbm_to_vmem [thread:$0]  %s2927_s4, 16, %s206_s2, [#allocation18]  }
  0x9b   :  { %s2299_s20 = scalar_lea.hbm %s2937_s9, 1024 }
  0x9c   :  { %p2300_p12 = scmp.ne.s32.totalorder %s2937_s9, %s2299_s20  ;;  %p2303_p13 = scmp.lt.u32.totalorder %s2299_s20, %s2937_s9 }
  0x9e   :  { %p2305_p0 = pnand %p2303_p13, %p2300_p12 }
  0xa0   :  { %2308 = shalt.err (!%p2305_p0)
}
  0xa1   :  { %s2309_s16 = scalar_lea.vmem %s3045_s10, 1024  ;;  %p2314_p2 = scmp.lt.s32.totalorder %s3045_s10, %s3045_s10 }
  0xa2   :  { %p2310_p1 = scmp.ne.s32.totalorder %s3045_s10, %s2309_s16  ;;  %p2315_p3 = scmp.lt.s32.totalorder %s2309_s16, %s2309_s16 }
  0xa4   :  { %p2316_p4 = por %p2315_p3, %p2314_p2 }
  0xa6   :  { %p2317_p5 = pnand %p2316_p4, %p2310_p1 }
  0xa8   :  { %2320 = shalt.err (!%p2317_p5)
}
  0xa9   :  { %230 = dma.hbm_to_vmem [thread:$0]  %s2937_s9, 1024, %s3045_s10, [#allocation21], %s2806_s28, %s2806_s28, %s2807_s30  }
  0xaa   :  { %s2810_s4 = smov [#allocation23]   ;;  %s2811_s22 = smov [#allocation26]  }
  0xab   :  { %s250_s18 = sshll.u32 %s2810_s4, 4  ;;  %s273_s0 = sshll.u32 %s2811_s22, 4  ;;  %s251_s18 = int_to_ptr.vmem [resolvable:$true] %s250_s18  ;;  %s274_s0 = int_to_ptr.vmem [resolvable:$true] %s273_s0 }
  0xac   :  { %s2321_s23 = scalar_lea.hbm %s2957_s21, 1024 }
  0xad   :  { %p2322_p6 = scmp.ne.s32.totalorder %s2957_s21, %s2321_s23  ;;  %p2325_p7 = scmp.lt.u32.totalorder %s2321_s23, %s2957_s21 }
  0xaf   :  { %p2327_p8 = pnand %p2325_p7, %p2322_p6 }
  0xb1   :  { %2330 = shalt.err (!%p2327_p8)
}
  0xb2   :  { %s2331_s14 = scalar_lea.vmem %s251_s18, 1024  ;;  %p2336_p10 = scmp.lt.s32.totalorder %s251_s18, %s251_s18 }
  0xb3   :  { %p2332_p9 = scmp.ne.s32.totalorder %s251_s18, %s2331_s14  ;;  %p2337_p11 = scmp.lt.s32.totalorder %s2331_s14, %s2331_s14 }
  0xb5   :  { %p2338_p12 = por %p2337_p11, %p2336_p10 }
  0xb7   :  { %p2339_p13 = pnand %p2338_p12, %p2332_p9 }
  0xb9   :  { %2342 = shalt.err (!%p2339_p13)
}
  0xba   :  { %256 = dma.hbm_to_vmem [thread:$0]  %s2957_s21, 1024, %s251_s18, [#allocation24], %s2806_s28, %s2806_s28, %s2807_s30  }
  0xbb   :  { %s2343_s9 = scalar_lea.hbm %s2967_s24, 16 }
  0xbc   :  { %p2344_p0 = scmp.ne.s32.totalorder %s2967_s24, %s2343_s9  ;;  %p2347_p1 = scmp.lt.u32.totalorder %s2343_s9, %s2967_s24 }
  0xbe   :  { %p2349_p2 = pnand %p2347_p1, %p2344_p0 }
  0xc0   :  { %2352 = shalt.err (!%p2349_p2)
}
  0xc1   :  { %s2353_s26 = scalar_lea.vmem %s274_s0, 16  ;;  %s2357_s1 = scalar_lea.vmem %s274_s0, 32 }
  0xc2   :  { %p2354_p3 = scmp.ne.s32.totalorder %s274_s0, %s2353_s26  ;;  %p2358_p4 = scmp.lt.s32.totalorder %s274_s0, %s274_s0 }
  0xc3   :  { %p2359_p5 = scmp.lt.s32.totalorder %s2357_s1, %s2353_s26 }
  0xc5   :  { %p2360_p6 = por %p2359_p5, %p2358_p4 }
  0xc7   :  { %p2361_p7 = pnand %p2360_p6, %p2354_p3 }
  0xc9   :  { %2364 = shalt.err (!%p2361_p7)
}
  0xca   :  { %276 = dma.hbm_to_vmem [thread:$0]  %s2967_s24, 16, %s274_s0, [#allocation27]  }
  0xcb   :  { %s2812_s2 = smov [#allocation29]   ;;  %s2813_s7 = smov [#allocation32]  }
  0xcc   :  { %s292_s21 = sshll.u32 %s2812_s2, 4  ;;  %s315_s10 = sshll.u32 %s2813_s7, 4  ;;  %s293_s21 = int_to_ptr.vmem [resolvable:$true] %s292_s21  ;;  %s316_s10 = int_to_ptr.vmem [resolvable:$true] %s315_s10 }
  0xcd   :  { %s2365_s11 = scalar_lea.hbm %s2977_s5, 1024 }
  0xce   :  { %p2366_p8 = scmp.ne.s32.totalorder %s2977_s5, %s2365_s11  ;;  %p2369_p9 = scmp.lt.u32.totalorder %s2365_s11, %s2977_s5 }
  0xd0   :  { %p2371_p10 = pnand %p2369_p9, %p2366_p8 }
  0xd2   :  { %2374 = shalt.err (!%p2371_p10)
}
  0xd3   :  { %s2375_s15 = scalar_lea.vmem %s293_s21, 1024  ;;  %p2380_p12 = scmp.lt.s32.totalorder %s293_s21, %s293_s21 }
  0xd4   :  { %p2376_p11 = scmp.ne.s32.totalorder %s293_s21, %s2375_s15  ;;  %p2381_p13 = scmp.lt.s32.totalorder %s2375_s15, %s2375_s15 }
  0xd6   :  { %p2382_p0 = por %p2381_p13, %p2380_p12 }
  0xd8   :  { %p2383_p1 = pnand %p2382_p0, %p2376_p11 }
  0xda   :  { %2386 = shalt.err (!%p2383_p1)
}
  0xdb   :  { %298 = dma.hbm_to_vmem [thread:$0]  %s2977_s5, 1024, %s293_s21, [#allocation30], %s2806_s28, %s2806_s28, %s2807_s30  }
  0xdc   :  { %s2387_s24 = scalar_lea.hbm %s2987_s6, 16 }
  0xdd   :  { %p2388_p2 = scmp.ne.s32.totalorder %s2987_s6, %s2387_s24  ;;  %p2391_p3 = scmp.lt.u32.totalorder %s2387_s24, %s2987_s6 }
  0xdf   :  { %p2393_p4 = pnand %p2391_p3, %p2388_p2 }
  0xe1   :  { %2396 = shalt.err (!%p2393_p4)
}
  0xe2   :  { %s2397_s29 = scalar_lea.vmem %s316_s10, 16  ;;  %s2401_s20 = scalar_lea.vmem %s316_s10, 32 }
  0xe3   :  { %p2398_p5 = scmp.ne.s32.totalorder %s316_s10, %s2397_s29  ;;  %p2402_p6 = scmp.lt.s32.totalorder %s316_s10, %s316_s10 }
  0xe4   :  { %p2403_p7 = scmp.lt.s32.totalorder %s2401_s20, %s2397_s29 }
  0xe6   :  { %p2404_p8 = por %p2403_p7, %p2402_p6 }
  0xe8   :  { %p2405_p9 = pnand %p2404_p8, %p2398_p5 }
  0xea   :  { %2408 = shalt.err (!%p2405_p9)
}
  0xeb   :  { %318 = dma.hbm_to_vmem [thread:$0]  %s2987_s6, 16, %s316_s10, [#allocation33]  }
  0xec   :  { %s2814_s16 = smov [#allocation35]   ;;  %s2815_s4 = smov [#allocation2]  }
  0xed   :  { %s334_s5 = sshll.u32 %s2814_s16, 4  ;;  %s103_s18 = sshll.u32 %s2815_s4, 4  ;;  %s335_s5 = int_to_ptr.vmem [resolvable:$true] %s334_s5  ;;  %s104_s18 = int_to_ptr.vmem [resolvable:$true] %s103_s18 }
  0xee   :  { %s2409_s22 = scalar_lea.hbm %s2997_s13, 1024 }
  0xef   :  { %p2410_p10 = scmp.ne.s32.totalorder %s2997_s13, %s2409_s22  ;;  %p2413_p11 = scmp.lt.u32.totalorder %s2409_s22, %s2997_s13 }
  0xf1   :  { %p2415_p12 = pnand %p2413_p11, %p2410_p10 }
  0xf3   :  { %2418 = shalt.err (!%p2415_p12)
}
  0xf4   :  { %s2419_s0 = scalar_lea.vmem %s335_s5, 1024  ;;  %p2424_p0 = scmp.lt.s32.totalorder %s335_s5, %s335_s5 }
  0xf5   :  { %p2420_p13 = scmp.ne.s32.totalorder %s335_s5, %s2419_s0  ;;  %p2425_p1 = scmp.lt.s32.totalorder %s2419_s0, %s2419_s0 }
  0xf7   :  { %p2426_p2 = por %p2425_p1, %p2424_p0 }
  0xf9   :  { %p2427_p3 = pnand %p2426_p2, %p2420_p13 }
  0xfb   :  { %2430 = shalt.err (!%p2427_p3)
}
  0xfc   :  { %340 = dma.hbm_to_vmem [thread:$0]  %s2997_s13, 1024, %s335_s5, [#allocation36], %s2806_s28, %s2806_s28, %s2807_s30  }
  0xfd   :  { %s2431_s6 = scalar_lea.hbm %s2857_s17, 128 }
  0xfe   :  { %p2432_p4 = scmp.ne.s32.totalorder %s2857_s17, %s2431_s6  ;;  %p2435_p5 = scmp.lt.u32.totalorder %s2431_s6, %s2857_s17 }
 0x100   :  { %p2437_p6 = pnand %p2435_p5, %p2432_p4 }
 0x102   :  { %2440 = shalt.err (!%p2437_p6)
}
 0x103   :  { %s2441_s23 = scalar_lea.vmem %s104_s18, 128  ;;  %p2446_p8 = scmp.lt.s32.totalorder %s104_s18, %s104_s18 }
 0x104   :  { %p2442_p7 = scmp.ne.s32.totalorder %s104_s18, %s2441_s23  ;;  %p2447_p9 = scmp.lt.s32.totalorder %s2441_s23, %s2441_s23 }
 0x106   :  { %p2448_p10 = por %p2447_p9, %p2446_p8 }
 0x108   :  { %p2449_p11 = pnand %p2448_p10, %p2442_p7 }
 0x10a   :  { %2452 = shalt.err (!%p2449_p11)
}
 0x10b   :  { %106 = dma.hbm_to_vmem [thread:$0]  %s2857_s17, 128, %s104_s18, [#allocation3]  }
 0x10c   :  { %s2816_s14 = smov [#allocation7]   ;;  %s2817_s13 = smov [#allocation10]  }
 0x10d   :  { %s129_s9 = sshll.u32 %s2816_s14, 4  ;;  %s149_s30 = sshll.u32 %s2817_s13, 4  ;;  %s130_s9 = int_to_ptr.vmem [resolvable:$true] %s129_s9  ;;  %s150_s30 = int_to_ptr.vmem [resolvable:$true] %s149_s30 }
 0x10e   :  { %s2453_s26 = scalar_lea.hbm %s2882_s8, 16 }
 0x10f   :  { %p2454_p12 = scmp.ne.s32.totalorder %s2882_s8, %s2453_s26  ;;  %p2457_p13 = scmp.lt.u32.totalorder %s2453_s26, %s2882_s8 }
 0x111   :  { %p2459_p0 = pnand %p2457_p13, %p2454_p12 }
 0x113   :  { %2462 = shalt.err (!%p2459_p0)
}
 0x114   :  { %s2463_s1 = scalar_lea.vmem %s130_s9, 16  ;;  %s2467_s2 = scalar_lea.vmem %s130_s9, 32 }
 0x115   :  { %p2464_p1 = scmp.ne.s32.totalorder %s130_s9, %s2463_s1  ;;  %p2468_p2 = scmp.lt.s32.totalorder %s130_s9, %s130_s9 }
 0x116   :  { %p2469_p3 = scmp.lt.s32.totalorder %s2467_s2, %s2463_s1 }
 0x118   :  { %p2470_p4 = por %p2469_p3, %p2468_p2 }
 0x11a   :  { %p2471_p5 = pnand %p2470_p4, %p2464_p1 }
 0x11c   :  { %2474 = shalt.err (!%p2471_p5)
}
 0x11d   :  { %132 = dma.hbm_to_vmem [thread:$0]  %s2882_s8, 16, %s130_s9, [#allocation6]  }
 0x11e   :  { %s2475_s17 = scalar_lea.hbm %s2892_s19, 16 }
 0x11f   :  { %p2476_p6 = scmp.ne.s32.totalorder %s2892_s19, %s2475_s17  ;;  %p2479_p7 = scmp.lt.u32.totalorder %s2475_s17, %s2892_s19 }
 0x121   :  { %p2481_p8 = pnand %p2479_p7, %p2476_p6 }
 0x123   :  { %2484 = shalt.err (!%p2481_p8)
}
 0x124   :  { %s2485_s21 = scalar_lea.vmem %s150_s30, 16  ;;  %s2489_s7 = scalar_lea.vmem %s150_s30, 32 }
 0x125   :  { %p2486_p9 = scmp.ne.s32.totalorder %s150_s30, %s2485_s21  ;;  %p2490_p10 = scmp.lt.s32.totalorder %s150_s30, %s150_s30 }
 0x126   :  { %p2491_p11 = scmp.lt.s32.totalorder %s2489_s7, %s2485_s21 }
 0x128   :  { %p2492_p12 = por %p2491_p11, %p2490_p10 }
 0x12a   :  { %p2493_p13 = pnand %p2492_p12, %p2486_p9 }
 0x12c   :  { %2496 = shalt.err (!%p2493_p13)
}
 0x12d   :  { %s3309_s10 = sld [smem:[#allocation63_spill]]  ;;  %s2818_s11 = smov [#allocation13]  }
 0x12e   :  { %152 = dma.hbm_to_vmem [thread:$0]  %s2892_s19, 16, %s150_s30, [#allocation9]  }
 0x12f   :  { %s173_s8 = sshll.u32 %s2818_s11, 4  ;;  %s2819_s15 = smov [#allocation16]   ;;  %s174_s8 = int_to_ptr.vmem [resolvable:$true] %s173_s8 }
 0x130   :  { %s195_s24 = sshll.u32 %s2819_s15, 4  ;;  %s196_s24 = int_to_ptr.vmem [resolvable:$true] %s195_s24 }
 0x133   :  { %s2497_s29 = scalar_lea.hbm %s3309_s10, 16 }
 0x134   :  { %p2498_p0 = scmp.ne.s32.totalorder %s3309_s10, %s2497_s29  ;;  %p2501_p1 = scmp.lt.u32.totalorder %s2497_s29, %s3309_s10 }
 0x136   :  { %p2503_p2 = pnand %p2501_p1, %p2498_p0 }
 0x138   :  { %2506 = shalt.err (!%p2503_p2)
}
 0x139   :  { %s2507_s20 = scalar_lea.vmem %s174_s8, 16  ;;  %s2511_s16 = scalar_lea.vmem %s174_s8, 32 }
 0x13a   :  { %p2508_p3 = scmp.ne.s32.totalorder %s174_s8, %s2507_s20  ;;  %p2512_p4 = scmp.lt.s32.totalorder %s174_s8, %s174_s8 }
 0x13b   :  { %p2513_p5 = scmp.lt.s32.totalorder %s2511_s16, %s2507_s20 }
 0x13d   :  { %p2514_p6 = por %p2513_p5, %p2512_p4 }
 0x13f   :  { %p2515_p7 = pnand %p2514_p6, %p2508_p3 }
 0x141   :  { %2518 = shalt.err (!%p2515_p7)
}
 0x142   :  { %s3310_s19 = sld [smem:[#allocation64_spill]] }
 0x143   :  { %176 = dma.hbm_to_vmem [thread:$0]  %s3309_s10, 16, %s174_s8, [#allocation12]  }
 0x148   :  { %s2519_s5 = scalar_lea.hbm %s3310_s19, 16 }
 0x149   :  { %p2520_p8 = scmp.ne.s32.totalorder %s3310_s19, %s2519_s5  ;;  %p2523_p9 = scmp.lt.u32.totalorder %s2519_s5, %s3310_s19 }
 0x14b   :  { %p2525_p10 = pnand %p2523_p9, %p2520_p8 }
 0x14d   :  { %2528 = shalt.err (!%p2525_p10)
}
 0x14e   :  { %s2529_s4 = scalar_lea.vmem %s196_s24, 16  ;;  %s2533_s18 = scalar_lea.vmem %s196_s24, 32 }
 0x14f   :  { %p2530_p11 = scmp.ne.s32.totalorder %s196_s24, %s2529_s4  ;;  %p2534_p12 = scmp.lt.s32.totalorder %s196_s24, %s196_s24 }
 0x150   :  { %p2535_p13 = scmp.lt.s32.totalorder %s2533_s18, %s2529_s4 }
 0x152   :  { %p2536_p0 = por %p2535_p13, %p2534_p12 }
 0x154   :  { %p2537_p1 = pnand %p2536_p0, %p2530_p11 }
 0x156   :  { %2540 = shalt.err (!%p2537_p1)
}
 0x157   :  { %s3311_s22 = sld [smem:[#allocation65_spill]]  ;;  %s2820_s0 = smov [#allocation19]  }
 0x158   :  { %198 = dma.hbm_to_vmem [thread:$0]  %s3310_s19, 16, %s196_s24, [#allocation15]  }
 0x159   :  { %s215_s6 = sshll.u32 %s2820_s0, 4  ;;  %s2821_s23 = smov [#allocation22]   ;;  %s216_s6 = int_to_ptr.vmem [resolvable:$true] %s215_s6 }
 0x15a   :  { %s237_s14 = sshll.u32 %s2821_s23, 4  ;;  %s238_s14 = int_to_ptr.vmem [resolvable:$true] %s237_s14 }
 0x15d   :  { %s2541_s9 = scalar_lea.hbm %s3311_s22, 16 }
 0x15e   :  { %p2542_p2 = scmp.ne.s32.totalorder %s3311_s22, %s2541_s9  ;;  %p2545_p3 = scmp.lt.u32.totalorder %s2541_s9, %s3311_s22 }
 0x160   :  { %p2547_p4 = pnand %p2545_p3, %p2542_p2 }
 0x162   :  { %2550 = shalt.err (!%p2547_p4)
}
 0x163   :  { %s2551_s13 = scalar_lea.vmem %s216_s6, 16  ;;  %s2555_s30 = scalar_lea.vmem %s216_s6, 32 }
 0x164   :  { %p2552_p5 = scmp.ne.s32.totalorder %s216_s6, %s2551_s13  ;;  %p2556_p6 = scmp.lt.s32.totalorder %s216_s6, %s216_s6 }
 0x165   :  { %p2557_p7 = scmp.lt.s32.totalorder %s2555_s30, %s2551_s13 }
 0x167   :  { %p2558_p8 = por %p2557_p7, %p2556_p6 }
 0x169   :  { %p2559_p9 = pnand %p2558_p8, %p2552_p5 }
 0x16b   :  { %2562 = shalt.err (!%p2559_p9)
}
 0x16c   :  { %s3312_s26 = sld [smem:[#allocation66_spill]] }
 0x16d   :  { %218 = dma.hbm_to_vmem [thread:$0]  %s3311_s22, 16, %s216_s6, [#allocation18]  }
 0x172   :  { %s2563_s1 = scalar_lea.hbm %s3312_s26, 16 }
 0x173   :  { %p2564_p10 = scmp.ne.s32.totalorder %s3312_s26, %s2563_s1  ;;  %p2567_p11 = scmp.lt.u32.totalorder %s2563_s1, %s3312_s26 }
 0x175   :  { %p2569_p12 = pnand %p2567_p11, %p2564_p10 }
 0x177   :  { %2572 = shalt.err (!%p2569_p12)
}
 0x178   :  { %s2573_s2 = scalar_lea.vmem %s238_s14, 16  ;;  %s2577_s17 = scalar_lea.vmem %s238_s14, 32 }
 0x179   :  { %p2574_p13 = scmp.ne.s32.totalorder %s238_s14, %s2573_s2  ;;  %p2578_p0 = scmp.lt.s32.totalorder %s238_s14, %s238_s14 }
 0x17a   :  { %p2579_p1 = scmp.lt.s32.totalorder %s2577_s17, %s2573_s2 }
 0x17c   :  { %p2580_p2 = por %p2579_p1, %p2578_p0 }
 0x17e   :  { %p2581_p3 = pnand %p2580_p2, %p2574_p13 }
 0x180   :  { %2584 = shalt.err (!%p2581_p3)
}
 0x181   :  { %s3313_s21 = sld [smem:[#allocation69_spill]]  ;;  %s2822_s7 = smov [#allocation25]  }
 0x182   :  { %240 = dma.hbm_to_vmem [thread:$0]  %s3312_s26, 16, %s238_s14, [#allocation21]  }
 0x183   :  { %s263_s10 = sshll.u32 %s2822_s7, 4  ;;  %s2823_s11 = smov [#allocation28]   ;;  %s264_s10 = int_to_ptr.vmem [resolvable:$true] %s263_s10 }
 0x184   :  { %s283_s8 = sshll.u32 %s2823_s11, 4  ;;  %s284_s8 = int_to_ptr.vmem [resolvable:$true] %s283_s8 }
 0x187   :  { %s2585_s15 = scalar_lea.hbm %s3313_s21, 16 }
 0x188   :  { %p2586_p4 = scmp.ne.s32.totalorder %s3313_s21, %s2585_s15  ;;  %p2589_p5 = scmp.lt.u32.totalorder %s2585_s15, %s3313_s21 }
 0x18a   :  { %p2591_p6 = pnand %p2589_p5, %p2586_p4 }
 0x18c   :  { %2594 = shalt.err (!%p2591_p6)
}
 0x18d   :  { %s2595_s24 = scalar_lea.vmem %s264_s10, 16  ;;  %s2599_s29 = scalar_lea.vmem %s264_s10, 32 }
 0x18e   :  { %p2596_p7 = scmp.ne.s32.totalorder %s264_s10, %s2595_s24  ;;  %p2600_p8 = scmp.lt.s32.totalorder %s264_s10, %s264_s10 }
 0x18f   :  { %p2601_p9 = scmp.lt.s32.totalorder %s2599_s29, %s2595_s24 }
 0x191   :  { %p2602_p10 = por %p2601_p9, %p2600_p8 }
 0x193   :  { %p2603_p11 = pnand %p2602_p10, %p2596_p7 }
 0x195   :  { %2606 = shalt.err (!%p2603_p11)
}
 0x196   :  { %s3314_s20 = sld [smem:[#allocation70_spill]] }
 0x197   :  { %266 = dma.hbm_to_vmem [thread:$0]  %s3313_s21, 16, %s264_s10, [#allocation24]  }
 0x19c   :  { %s2607_s16 = scalar_lea.hbm %s3314_s20, 16 }
 0x19d   :  { %p2608_p12 = scmp.ne.s32.totalorder %s3314_s20, %s2607_s16  ;;  %p2611_p13 = scmp.lt.u32.totalorder %s2607_s16, %s3314_s20 }
 0x19f   :  { %p2613_p0 = pnand %p2611_p13, %p2608_p12 }
 0x1a1   :  { %2616 = shalt.err (!%p2613_p0)
}
 0x1a2   :  { %s2617_s19 = scalar_lea.vmem %s284_s8, 16  ;;  %s2621_s5 = scalar_lea.vmem %s284_s8, 32 }
 0x1a3   :  { %p2618_p1 = scmp.ne.s32.totalorder %s284_s8, %s2617_s19  ;;  %p2622_p2 = scmp.lt.s32.totalorder %s284_s8, %s284_s8 }
 0x1a4   :  { %p2623_p3 = scmp.lt.s32.totalorder %s2621_s5, %s2617_s19 }
 0x1a6   :  { %p2624_p4 = por %p2623_p3, %p2622_p2 }
 0x1a8   :  { %p2625_p5 = pnand %p2624_p4, %p2618_p1 }
 0x1aa   :  { %2628 = shalt.err (!%p2625_p5)
}
 0x1ab   :  { %s3315_s4 = sld [smem:[#allocation71_spill]]  ;;  %s2824_s18 = smov [#allocation31]  }
 0x1ac   :  { %286 = dma.hbm_to_vmem [thread:$0]  %s3314_s20, 16, %s284_s8, [#allocation27]  }
 0x1ad   :  { %s305_s22 = sshll.u32 %s2824_s18, 4  ;;  %s2825_s0 = smov [#allocation34]   ;;  %s306_s22 = int_to_ptr.vmem [resolvable:$true] %s305_s22 }
 0x1ae   :  { %s325_s6 = sshll.u32 %s2825_s0, 4  ;;  %s326_s6 = int_to_ptr.vmem [resolvable:$true] %s325_s6 }
 0x1b1   :  { %s2629_s23 = scalar_lea.hbm %s3315_s4, 16 }
 0x1b2   :  { %p2630_p6 = scmp.ne.s32.totalorder %s3315_s4, %s2629_s23  ;;  %p2633_p7 = scmp.lt.u32.totalorder %s2629_s23, %s3315_s4 }
 0x1b4   :  { %p2635_p8 = pnand %p2633_p7, %p2630_p6 }
 0x1b6   :  { %2638 = shalt.err (!%p2635_p8)
}
 0x1b7   :  { %s2639_s14 = scalar_lea.vmem %s306_s22, 16  ;;  %s2643_s9 = scalar_lea.vmem %s306_s22, 32 }
 0x1b8   :  { %p2640_p9 = scmp.ne.s32.totalorder %s306_s22, %s2639_s14  ;;  %p2644_p10 = scmp.lt.s32.totalorder %s306_s22, %s306_s22 }
 0x1b9   :  { %p2645_p11 = scmp.lt.s32.totalorder %s2643_s9, %s2639_s14 }
 0x1bb   :  { %p2646_p12 = por %p2645_p11, %p2644_p10 }
 0x1bd   :  { %p2647_p13 = pnand %p2646_p12, %p2640_p9 }
 0x1bf   :  { %2650 = shalt.err (!%p2647_p13)
}
 0x1c0   :  { %s3316_s13 = sld [smem:[#allocation72_spill]] }
 0x1c1   :  { %308 = dma.hbm_to_vmem [thread:$0]  %s3315_s4, 16, %s306_s22, [#allocation30]  }
 0x1c6   :  { %s2651_s30 = scalar_lea.hbm %s3316_s13, 16 }
 0x1c7   :  { %p2652_p0 = scmp.ne.s32.totalorder %s3316_s13, %s2651_s30  ;;  %p2655_p1 = scmp.lt.u32.totalorder %s2651_s30, %s3316_s13 }
 0x1c9   :  { %p2657_p2 = pnand %p2655_p1, %p2652_p0 }
 0x1cb   :  { %2660 = shalt.err (!%p2657_p2)
}
 0x1cc   :  { %s2661_s26 = scalar_lea.vmem %s326_s6, 16  ;;  %s2665_s1 = scalar_lea.vmem %s326_s6, 32 }
 0x1cd   :  { %p2662_p3 = scmp.ne.s32.totalorder %s326_s6, %s2661_s26  ;;  %p2666_p4 = scmp.lt.s32.totalorder %s326_s6, %s326_s6 }
 0x1ce   :  { %p2667_p5 = scmp.lt.s32.totalorder %s2665_s1, %s2661_s26 }
 0x1d0   :  { %p2668_p6 = por %p2667_p5, %p2666_p4 }
 0x1d2   :  { %p2669_p7 = pnand %p2668_p6, %p2662_p3 }
 0x1d4   :  { %2672 = shalt.err (!%p2669_p7)
}
 0x1d5   :  { %328 = dma.hbm_to_vmem [thread:$0]  %s3316_s13, 16, %s326_s6, [#allocation33]  }
 0x1d6   :  { %s2826_s2 = smov [#allocation37]   ;;  %s2673_s21 = scalar_lea.hbm %s3002_s3, 16 }
 0x1d7   :  { %s347_s17 = sshll.u32 %s2826_s2, 4  ;;  %p2674_p8 = scmp.ne.s32.totalorder %s3002_s3, %s2673_s21  ;;  %s348_s17 = int_to_ptr.vmem [resolvable:$true] %s347_s17 }
 0x1d8   :  { %p2677_p9 = scmp.lt.u32.totalorder %s2673_s21, %s3002_s3 }
 0x1da   :  { %p2679_p10 = pnand %p2677_p9, %p2674_p8 }
 0x1dc   :  { %2682 = shalt.err (!%p2679_p10)
}
 0x1dd   :  { %s2683_s7 = scalar_lea.vmem %s348_s17, 16  ;;  %s2687_s10 = scalar_lea.vmem %s348_s17, 32 }
 0x1de   :  { %p2684_p11 = scmp.ne.s32.totalorder %s348_s17, %s2683_s7  ;;  %p2688_p12 = scmp.lt.s32.totalorder %s348_s17, %s348_s17 }
 0x1df   :  { %p2689_p13 = scmp.lt.s32.totalorder %s2687_s10, %s2683_s7 }
 0x1e1   :  { %p2690_p0 = por %p2689_p13, %p2688_p12 }
 0x1e3   :  { %p2691_p1 = pnand %p2690_p0, %p2684_p11 }
 0x1e5   :  { %2694 = shalt.err (!%p2691_p1)
}
 0x1e6   :  { %350 = dma.hbm_to_vmem [thread:$0]  %s3002_s3, 16, %s348_s17, [#allocation36]  }
 0x1e7   :  { %2739 = dma.done.wait [#allocation3], 128  }
 0x1e8   :  { %2740 = vsyncadd [#allocation3], 4294967168 }
 0x1e9   :  { %2741 = dma.done.wait [#allocation6], 32  }
 0x1ea   :  { %2742 = vsyncadd [#allocation6], 4294967264 }
 0x1eb   :  { %2743 = dma.done.wait [#allocation9], 32  }
 0x1ec   :  { %2744 = vsyncadd [#allocation9], 4294967264 }
 0x1ed   :  { %2745 = dma.done.wait [#allocation12], 32  }
 0x1ee   :  { %2746 = vsyncadd [#allocation12], 4294967264 }
 0x1ef   :  { %2747 = dma.done.wait [#allocation15], 272  }
 0x1f0   :  { %2748 = vsyncadd [#allocation15], 4294967024 }
 0x1f1   :  { %2749 = dma.done.wait [#allocation18], 32  }
 0x1f2   :  { %2750 = vsyncadd [#allocation18], 4294967264 }
 0x1f3   :  { %2751 = dma.done.wait [#allocation21], 1040  }
 0x1f4   :  { %2752 = vsyncadd [#allocation21], 4294966256 }
 0x1f5   :  { %2753 = dma.done.wait [#allocation24], 1040  }
 0x1f6   :  { %2754 = vsyncadd [#allocation24], 4294966256 }
 0x1f7   :  { %2755 = dma.done.wait [#allocation27], 32  }
 0x1f8   :  { %2756 = vsyncadd [#allocation27], 4294967264 }
 0x1f9   :  { %2757 = dma.done.wait [#allocation30], 1040  }
 0x1fa   :  { %2758 = vsyncadd [#allocation30], 4294966256 }
 0x1fb   :  { %2759 = dma.done.wait [#allocation33], 32  }
 0x1fc   :  { %2760 = vsyncadd [#allocation33], 4294967264 }
 0x1fd   :  { %2761 = dma.done.wait [#allocation36], 1040  }
 0x1fe   :  { %2762 = vsyncadd [#allocation36], 4294966256  ;;  %s3317_s3 = sld [smem:[#allocation55_spill]]  ;;  %s3318_s11 = sld [smem:[#allocation60_spill]]  ;;  %v2827_v0 = vmov 64   ;;  %v2828_v1 = vmov 66  }
 0x1ff   :  { %2107 = vset.pattern.permute.xlu0 %v2827_v0  ;;  %2109 = vset.pattern.permute.xlu1 %v2828_v1  ;;  %v2829_v3 = vmov 65   ;;  %v2830_v5 = vmov 0.0   ;;  %vm2831_vm0 = vmmov 0   ;;  %s3319_s8 = sld [smem:[#allocation58_spill]]  ;;  %v1707_v13 = vld [vmem:[#allocation2] ss:$0 sm:$0xff] }
 0x200   :  { %1872 = vmatprep.subr.bf16.mxu0 %v2830_v5  ;;  %1892 = vmatprep.subr.bf16.mxu1 %v2830_v5  ;;  %v1709_v17 = vld [vmem:[#allocation2 + $0x1] ss:$0 sm:$0xff]  ;;  %v1710_v18 = vld [vmem:[#allocation2 + $0x2] ss:$0 sm:$0xff]  ;;  %s3320_s15 = sld [smem:[#allocation59_spill]]  ;;  %s3321_s24 = sld [smem:[#allocation61_spill]] }
 0x201   :  { %1888 = vmatprep.mubr.msk.bf16.mxu0 %vm2831_vm0, %v2830_v5  ;;  %1908 = vmatprep.mubr.msk.bf16.mxu1 %vm2831_vm0, %v2830_v5  ;;  %v1712_v47 = vld [vmem:[#allocation5] ss:$0 sm:$0xff]  ;;  %s3322_s29 = sld [smem:[#allocation62_spill]]  ;;  %s3323_s20 = sld [smem:[#allocation56_spill]]  ;;  %vm898_vm1 = vcmask 261120  }
 0x202   :  { %s3324_s16 = sld [smem:[#allocation67_spill]]  ;;  %s3325_s19 = sld [smem:[#allocation68_spill]] }
 0x203   :  { %s3326_s5 = sld [smem:[#allocation57_spill]] }
 0x204   :  { %v3141_v2 = vld [vmem:[%s3317_s3] sm:$0xff]  ;;  %v2112_v6 = vld [vmem:[%s3318_s11 + $0x8] sm:$0xff]   ;;  %v2113_v7 = vld [vmem:[%s3318_s11 + $0x10] sm:$0xff]  }
 0x205   :  { %426 = vperm.xlu0 %2107, %v3141_v2   ;;  %454 = vperm.xlu1 %2109, %v3141_v2   ;;  %v2111_v4 = vld [vmem:[%s3318_s11] sm:$0xff]   ;;  %v2114_v8 = vld [vmem:[%s3318_s11 + $0x18] sm:$0xff]   ;;  %v2116_v10 = vld [vmem:[%s3318_s11 + $0x28] sm:$0xff]  }
 0x206   :  { %1873 = vmatpush3.bf16.msra.mxu0 %v2111_v4  ;;  %v2115_v9 = vld [vmem:[%s3318_s11 + $0x20] sm:$0xff]   ;;  %v2117_v11 = vld [vmem:[%s3318_s11 + $0x30] sm:$0xff]   ;;  %v2118_v12 = vld [vmem:[%s3318_s11 + $0x38] sm:$0xff]  }
 0x207   :  { %1874 = vmatprep.subr.bf16.mxu0 %v2830_v5  ;;  %v1708_v16 = vld [vmem:[%s3319_s8] ss:$0 sm:$0xff]  ;;  %v2120_v52 = vld [vmem:[%s3321_s24 + $0x8] sm:$0xff]   ;;  %v2121_v53 = vld [vmem:[%s3321_s24 + $0x10] sm:$0xff]  }
 0x208   :  { %v1711_v45 = vld [vmem:[%s3320_s15] ss:$0 sm:$0xff]  ;;  %v2122_v54 = vld [vmem:[%s3321_s24 + $0x18] sm:$0xff]   ;;  %v2124_v56 = vld [vmem:[%s3321_s24 + $0x28] sm:$0xff]  }
 0x209   :  { %2108 = vset.pattern.permute.xlu0 %v2829_v3  ;;  %v2119_v51 = vld [vmem:[%s3321_s24] sm:$0xff]   ;;  %v2125_v57 = vld [vmem:[%s3321_s24 + $0x30] sm:$0xff]   ;;  %v2126_v58 = vld [vmem:[%s3321_s24 + $0x38] sm:$0xff]  }
 0x20a   :  { %443 = vperm.xlu0 %2108, %v3141_v2   ;;  %1875 = vmatpush3.bf16.msra.mxu0 %v2112_v6  ;;  %v2123_v55 = vld [vmem:[%s3321_s24 + $0x20] sm:$0xff]   ;;  %v2130_v60 = vld [vmem:[%s3322_s29 + $0x8] sm:$0xff]   ;;  %v2131_v61 = vld [vmem:[%s3322_s29 + $0x10] sm:$0xff]  }
 0x20b   :  { %1876 = vmatprep.subr.bf16.mxu0 %v2830_v5  ;;  %1893 = vmatpush3.bf16.msra.mxu1 %v2119_v51  ;;  %v2129_v59 = vld [vmem:[%s3322_s29] sm:$0xff]   ;;  %v2132_v62 = vld [vmem:[%s3322_s29 + $0x18] sm:$0xff]   ;;  %v2134_v0 = vld [vmem:[%s3322_s29 + $0x28] sm:$0xff]  }
 0x20c   :  { %1894 = vmatprep.subr.bf16.mxu1 %v2830_v5  ;;  %v2133_v63 = vld [vmem:[%s3322_s29 + $0x20] sm:$0xff]  }
 0x20e   :  { %2110 = vset.pattern.permute.xlu0 %v2828_v1  ;;  %1877 = vmatpush3.bf16.msra.mxu0 %v2113_v7  ;;  %v1713_v1 = vld [vmem:[#allocation7] ss:$0 sm:$0xff] }
 0x20f   :  { %1878 = vmatprep.subr.bf16.mxu0 %v2830_v5  ;;  %1895 = vmatpush3.bf16.msra.mxu1 %v2120_v52 }
 0x210   :  { %1896 = vmatprep.subr.bf16.mxu1 %v2830_v5 }
 0x212   :  { %1879 = vmatpush3.bf16.msra.mxu0 %v2114_v8 }
 0x213   :  { %1880 = vmatprep.subr.bf16.mxu0 %v2830_v5  ;;  %1897 = vmatpush3.bf16.msra.mxu1 %v2121_v53 }
 0x214   :  { %1898 = vmatprep.subr.bf16.mxu1 %v2830_v5 }
 0x216   :  { %1881 = vmatpush3.bf16.msra.mxu0 %v2115_v9 }
 0x217   :  { %1882 = vmatprep.subr.bf16.mxu0 %v2830_v5  ;;  %1899 = vmatpush3.bf16.msra.mxu1 %v2122_v54 }
 0x218   :  { %1900 = vmatprep.subr.bf16.mxu1 %v2830_v5 }
 0x21a   :  { %1883 = vmatpush3.bf16.msra.mxu0 %v2116_v10 }
 0x21b   :  { %1884 = vmatprep.subr.bf16.mxu0 %v2830_v5  ;;  %1901 = vmatpush3.bf16.msra.mxu1 %v2123_v55 }
 0x21c   :  { %1902 = vmatprep.subr.bf16.mxu1 %v2830_v5 }
 0x21e   :  { %1885 = vmatpush3.bf16.msra.mxu0 %v2117_v11 }
 0x21f   :  { %1886 = vmatprep.subr.bf16.mxu0 %v2830_v5  ;;  %1903 = vmatpush3.bf16.msra.mxu1 %v2124_v56  ;;  %v1742_v56 = vld [vmem:[#allocation16] ss:$0 sm:$0xff] }
 0x220   :  { %1904 = vmatprep.subr.bf16.mxu1 %v2830_v5 }
 0x222   :  { %1887 = vmatpush3.bf16.msra.mxu0 %v2118_v12 }
 0x223   :  { %1912 = vmatprep.subr.bf16.mxu0 %v2830_v5  ;;  %1905 = vmatpush3.bf16.msra.mxu1 %v2125_v57 }
 0x224   :  { %1906 = vmatprep.subr.bf16.mxu1 %v2830_v5 }
 0x227   :  { %1907 = vmatpush3.bf16.msra.mxu1 %v2126_v58 }
 0x228   :  { %1932 = vmatprep.subr.bf16.mxu1 %v2830_v5 }
 0x284   :  { %v427_v14 = vpop.permute.xlu0 %426  ;;  %v455_v19 = vpop.permute.xlu1 %454 }
 0x285   :  { %v433_v15 = vmul.f32 %v1707_v13, %v427_v14  ;;  %v461_v23 = vmul.f32 %v1710_v18, %v455_v19 }
 0x287   :  { %v440_v21 = vadd.f32 %v1708_v16, %v433_v15 }
 0x289   :  { %v444_v20 = vpop.permute.xlu0 %443 }
 0x28a   :  { %v450_v22 = vmul.f32 %v1709_v17, %v444_v20 }
 0x28c   :  { %v451_v24 = vadd.f32 %v450_v22, %v440_v21 }
 0x28e   :  { %v462_v25 = vadd.f32 %v461_v23, %v451_v24 }
 0x290   :  { %v463_v26 = vmax.f32 %v462_v25, 0.0 }
 0x292   :  { %v464_v27 = vrot.slane %v463_v26, 4 }
 0x294   :  { %v465_v28 = vadd.f32 %v464_v27, %v463_v26 }
 0x296   :  { %v466_v29 = vrot.slane %v465_v28, 2 }
 0x298   :  { %v467_v30 = vadd.f32 %v466_v29, %v465_v28  ;;  %v1722_v28 = vld [vmem:[#allocation8] ss:$0 sm:$0xff] }
 0x29a   :  { %v468_v31 = vrot.slane %v467_v30, 1 }
 0x29c   :  { %v469_v32 = vadd.f32 %v468_v31, %v467_v30  ;;  %v1723_v30 = vld [vmem:[#allocation10] ss:$0 sm:$0xff] }
 0x29e   :  { %v470_v33 = vmul.f32 0.125, %v469_v32 }
 0x2a0   :  { %v471_v34 = vsub.f32 %v463_v26, %v470_v33  ;;  %v2127_v33 = vld [vmem:[#allocation14] sm:$0xff]  }
 0x2a2   :  { %v472_v35 = vmul.f32 %v471_v34, %v471_v34 }
 0x2a4   :  { %v473_v36 = vrot.slane %v472_v35, 4 }
 0x2a6   :  { %v474_v37 = vadd.f32 %v473_v36, %v472_v35  ;;  %v2128_v35 = vld [vmem:[#allocation14 + $0x8] sm:$0xff]  }
 0x2a7   :  { %v873_v36 = vld [vmem:[%s3323_s20] sm:$0xff] }
 0x2a8   :  { %v475_v38 = vrot.slane %v474_v37, 2 }
 0x2aa   :  { %v476_v39 = vadd.f32 %v475_v38, %v474_v37  ;;  %v874_v37 = vpack.c.bf16 %v873_v36, %v873_v36  ;;  %v2135_v38 = vld [vmem:[%s3322_s29 + $0x30] sm:$0xff]  }
 0x2ac   :  { %v477_v40 = vrot.slane %v476_v39, 1 }
 0x2ae   :  { %v478_v41 = vadd.f32 %v477_v40, %v476_v39  ;;  %v2136_v39 = vld [vmem:[%s3322_s29 + $0x38] sm:$0xff]   ;;  %v2137_v40 = vld [vmem:[#allocation20] sm:$0xff]  }
 0x2b0   :  { %v479_v42 = vmul.f32 0.125, %v478_v41  ;;  %v2138_v41 = vld [vmem:[#allocation20 + $0x8] sm:$0xff]  }
 0x2b2   :  { %v480_v43 = vadd.f32 1e-05, %v479_v42  ;;  %v2139_v42 = vld [vmem:[#allocation20 + $0x10] sm:$0xff]  }
 0x2b4   :  { %2177 = vrsqrt.f32 %v480_v43  ;;  %v2140_v43 = vld [vmem:[#allocation20 + $0x18] sm:$0xff]  }
 0x2be   :  { %v2178_v44 = vpop.eup %2177 }
 0x2bf   :  { %v482_v46 = vmul.f32 %v2178_v44, %v471_v34  ;;  %v2141_v44 = vld [vmem:[#allocation20 + $0x20] sm:$0xff]  }
 0x2c1   :  { %v490_v48 = vmul.f32 %v1711_v45, %v482_v46  ;;  %v2142_v45 = vld [vmem:[#allocation20 + $0x28] sm:$0xff]   ;;  %v2143_v46 = vld [vmem:[#allocation20 + $0x30] sm:$0xff]  }
 0x2c3   :  { %v498_v49 = vadd.f32 %v1712_v47, %v490_v48  ;;  %v2144_v47 = vld [vmem:[#allocation20 + $0x38] sm:$0xff]   ;;  %v1724_v48 = vld [vmem:[#allocation11] ss:$0 sm:$0xff] }
 0x2c5   :  { %v499_v50 = vpack.c.bf16 %v498_v49, %v498_v49 }
 0x2c7   :  { %1889 = vmatmul.mubr.bf16.vlgmr.msra.gmra.mrb[0].mxu0 %v499_v50 }
 0x2c8   :  { %1928 = vmatprep.mubr.msk.bf16.mxu0 %vm2831_vm0, %v2830_v5  ;;  %1913 = vmatpush3.bf16.msra.mxu0 %v2129_v59 }
 0x2c9   :  { %1914 = vmatprep.subr.bf16.mxu0 %v2830_v5 }
 0x2cc   :  { %1915 = vmatpush3.bf16.msra.mxu0 %v2130_v60 }
 0x2cd   :  { %1916 = vmatprep.subr.bf16.mxu0 %v2830_v5 }
 0x2d0   :  { %1917 = vmatpush3.bf16.msra.mxu0 %v2131_v61 }
 0x2d1   :  { %1918 = vmatprep.subr.bf16.mxu0 %v2830_v5 }
 0x2d4   :  { %1919 = vmatpush3.bf16.msra.mxu0 %v2132_v62 }
 0x2d5   :  { %1920 = vmatprep.subr.bf16.mxu0 %v2830_v5 }
 0x2d8   :  { %1921 = vmatpush3.bf16.msra.mxu0 %v2133_v63 }
 0x2d9   :  { %1922 = vmatprep.subr.bf16.mxu0 %v2830_v5 }
 0x2dc   :  { %1923 = vmatpush3.bf16.msra.mxu0 %v2134_v0 }
 0x2dd   :  { %1924 = vmatprep.subr.bf16.mxu0 %v2830_v5 }
 0x2e0   :  { %1925 = vmatpush3.bf16.msra.mxu0 %v2135_v38 }
 0x2e1   :  { %1926 = vmatprep.subr.bf16.mxu0 %v2830_v5 }
 0x2e4   :  { %1927 = vmatpush3.bf16.msra.mxu0 %v2136_v39  ;;  %v1748_v39 = vld [vmem:[#allocation22] ss:$0 sm:$0xff] }
 0x2e5   :  { %1960 = vmatprep.subr.bf16.mxu0 %v2830_v5 }
 0x39a   :  { %v605_v3 = vpop.f32.mrb[0].mxu0 }
 0x39b   :  { %v606_v4 = vadd.f32 %v1713_v1, %v605_v3  ;;  %v1890_v6 = vpop.f32.mrb[1].mxu0 }
 0x39c   :  { %v608_v7 = vpop.f32.mrb[2].mxu0 }
 0x39d   :  { %v611_v8 = vmax.f32 %v606_v4, 0.0  ;;  %v1891_v9 = vpop.f32.mrb[3].mxu0 }
 0x39f   :  { %v612_v10 = vrot.slane %v611_v8, 4 }
 0x3a1   :  { %v613_v11 = vadd.f32 %v612_v10, %v611_v8 }
 0x3a3   :  { %v614_v12 = vrot.slane %v613_v11, 2 }
 0x3a5   :  { %v615_v13 = vadd.f32 %v614_v12, %v613_v11 }
 0x3a7   :  { %v616_v14 = vrot.slane %v615_v13, 1 }
 0x3a9   :  { %v617_v15 = vadd.f32 %v616_v14, %v615_v13 }
 0x3ab   :  { %v618_v16 = vmul.f32 0.125, %v617_v15 }
 0x3ad   :  { %v619_v17 = vsub.f32 %v611_v8, %v618_v16 }
 0x3af   :  { %v620_v18 = vmul.f32 %v619_v17, %v619_v17 }
 0x3b1   :  { %v621_v19 = vrot.slane %v620_v18, 4 }
 0x3b3   :  { %v622_v20 = vadd.f32 %v621_v19, %v620_v18  ;;  %v1746_v19 = vld [vmem:[#allocation17] ss:$0 sm:$0xff] }
 0x3b5   :  { %v623_v21 = vrot.slane %v622_v20, 2 }
 0x3b7   :  { %v624_v22 = vadd.f32 %v623_v21, %v622_v20  ;;  %v1747_v21 = vld [vmem:[#allocation19] ss:$0 sm:$0xff] }
 0x3b9   :  { %v625_v23 = vrot.slane %v624_v22, 1 }
 0x3bb   :  { %v626_v24 = vadd.f32 %v625_v23, %v624_v22 }
 0x3bd   :  { %v627_v25 = vmul.f32 0.125, %v626_v24 }
 0x3bf   :  { %v628_v26 = vadd.f32 1e-05, %v627_v25  ;;  %v2145_v25 = vld [vmem:[%s3324_s16] sm:$0xff]  }
 0x3c1   :  { %2179 = vrsqrt.f32 %v628_v26  ;;  %v2146_v26 = vld [vmem:[%s3324_s16 + $0x8] sm:$0xff]  }
 0x3cb   :  { %v2180_v27 = vpop.eup %2179 }
 0x3cc   :  { %v630_v29 = vmul.f32 %v2180_v27, %v619_v17  ;;  %v2147_v27 = vld [vmem:[%s3324_s16 + $0x10] sm:$0xff]  }
 0x3ce   :  { %v638_v31 = vmul.f32 %v1722_v28, %v630_v29  ;;  %v2148_v28 = vld [vmem:[%s3324_s16 + $0x18] sm:$0xff]   ;;  %v2149_v29 = vld [vmem:[%s3324_s16 + $0x20] sm:$0xff]  }
 0x3d0   :  { %v646_v32 = vadd.f32 %v1723_v30, %v638_v31  ;;  %v2150_v30 = vld [vmem:[%s3324_s16 + $0x28] sm:$0xff]   ;;  %v2151_v31 = vld [vmem:[%s3324_s16 + $0x30] sm:$0xff]  }
 0x3d2   :  { %v647_v34 = vpack.c.bf16 %v646_v32, %v646_v32  ;;  %v2152_v32 = vld [vmem:[%s3324_s16 + $0x38] sm:$0xff]  }
 0x3d4   :  { %1909 = vmatmul.mubr.bf16.vlgmr.msra.gmra.mrb[0].mxu1 %v647_v34 }
 0x3d5   :  { %1933 = vmatpush3.bf16.msra.mxu1 %v2127_v33  ;;  %1936 = vmatprep.mubr.msk.bf16.mxu1 %vm2831_vm0, %v2830_v5  ;;  %v1733_v33 = vld [vmem:[#allocation13] ss:$0 sm:$0xff] }
 0x3d6   :  { %1934 = vmatprep.subr.bf16.mxu1 %v2830_v5 }
 0x3d9   :  { %1935 = vmatpush3.bf16.msra.mxu1 %v2128_v35 }
 0x3da   :  { %1940 = vmatprep.subr.bf16.mxu1 %v2830_v5 }
 0x3dc   :  { %1937 = vmatmul.mubr.msk.bf16.vlgmr.msra.gmra.mrb[4].mxu1 %vm898_vm1, %v874_v37 }
 0x3dd   :  { %1956 = vmatprep.mubr.msk.bf16.mxu1 %vm2831_vm0, %v2830_v5  ;;  %1941 = vmatpush3.bf16.msra.mxu1 %v2137_v40 }
 0x3de   :  { %1942 = vmatprep.subr.bf16.mxu1 %v2830_v5 }
 0x3e1   :  { %1943 = vmatpush3.bf16.msra.mxu1 %v2138_v41 }
 0x3e2   :  { %1944 = vmatprep.subr.bf16.mxu1 %v2830_v5 }
 0x3e5   :  { %1945 = vmatpush3.bf16.msra.mxu1 %v2139_v42 }
 0x3e6   :  { %1946 = vmatprep.subr.bf16.mxu1 %v2830_v5 }
 0x3e9   :  { %1947 = vmatpush3.bf16.msra.mxu1 %v2140_v43 }
 0x3ea   :  { %1948 = vmatprep.subr.bf16.mxu1 %v2830_v5 }
 0x3ed   :  { %1949 = vmatpush3.bf16.msra.mxu1 %v2141_v44 }
 0x3ee   :  { %1950 = vmatprep.subr.bf16.mxu1 %v2830_v5 }
 0x3f1   :  { %1951 = vmatpush3.bf16.msra.mxu1 %v2142_v45 }
 0x3f2   :  { %1952 = vmatprep.subr.bf16.mxu1 %v2830_v5 }
 0x3f5   :  { %1953 = vmatpush3.bf16.msra.mxu1 %v2143_v46 }
 0x3f6   :  { %1954 = vmatprep.subr.bf16.mxu1 %v2830_v5 }
 0x3f9   :  { %1955 = vmatpush3.bf16.msra.mxu1 %v2144_v47  ;;  %v2153_v47 = vld [vmem:[#allocation23] sm:$0xff]  }
 0x3fa   :  { %1980 = vmatprep.subr.bf16.mxu1 %v2830_v5 }
 0x4a7   :  { %v753_v49 = vpop.f32.mrb[0].mxu1 }
 0x4a8   :  { %v754_v50 = vadd.f32 %v1724_v48, %v753_v49  ;;  %v1910_v51 = vpop.f32.mrb[1].mxu1  ;;  %v2154_v48 = vld [vmem:[#allocation23 + $0x8] sm:$0xff]   ;;  %v2155_v49 = vld [vmem:[#allocation23 + $0x10] sm:$0xff]  }
 0x4a9   :  { %v756_v52 = vpop.f32.mrb[2].mxu1  ;;  %v2157_v51 = vld [vmem:[#allocation23 + $0x20] sm:$0xff]  }
 0x4aa   :  { %v759_v53 = vmax.f32 %v754_v50, 0.0  ;;  %v1911_v54 = vpop.f32.mrb[3].mxu1  ;;  %v2156_v50 = vld [vmem:[#allocation23 + $0x18] sm:$0xff]   ;;  %v1757_v52 = vld [vmem:[%s3325_s19] ss:$0 sm:$0xff] }
 0x4ab   :  { %v2158_v54 = vld [vmem:[#allocation23 + $0x28] sm:$0xff]  }
 0x4ac   :  { %v760_v55 = vpack.c.bf16 %v759_v53, %v759_v53 }
 0x4ae   :  { %1929 = vmatmul.mubr.bf16.vlgmr.msra.gmra.mrb[4].mxu0 %v760_v55 }
 0x4af   :  { %v936_v57 = vpop.f32.mrb[4].mxu1  ;;  %1976 = vmatprep.mubr.msk.bf16.mxu0 %vm2831_vm0, %v2830_v5  ;;  %1961 = vmatpush3.bf16.msra.mxu0 %v2145_v25 }
 0x4b0   :  { %v937_v58 = vadd.f32 %v1742_v56, %v936_v57  ;;  %v1938_v59 = vpop.f32.mrb[5].mxu1  ;;  %1962 = vmatprep.subr.bf16.mxu0 %v2830_v5 }
 0x4b1   :  { %v939_v60 = vpop.f32.mrb[6].mxu1  ;;  %v2159_v59 = vld [vmem:[#allocation23 + $0x30] sm:$0xff]  }
 0x4b2   :  { %v942_v61 = vmax.f32 %v937_v58, 0.0  ;;  %v1939_v62 = vpop.f32.mrb[7].mxu1  ;;  %v2160_v60 = vld [vmem:[#allocation23 + $0x38] sm:$0xff]  }
 0x4b3   :  { %1963 = vmatpush3.bf16.msra.mxu0 %v2146_v26 }
 0x4b4   :  { %v943_v63 = vrot.slane %v942_v61, 4  ;;  %1964 = vmatprep.subr.bf16.mxu0 %v2830_v5 }
 0x4b6   :  { %v944_v0 = vadd.f32 %v943_v63, %v942_v61 }
 0x4b7   :  { %1965 = vmatpush3.bf16.msra.mxu0 %v2147_v27 }
 0x4b8   :  { %v945_v1 = vrot.slane %v944_v0, 2  ;;  %1966 = vmatprep.subr.bf16.mxu0 %v2830_v5 }
 0x4ba   :  { %v946_v3 = vadd.f32 %v945_v1, %v944_v0  ;;  %v1204_v0 = vlaneseq }
 0x4bb   :  { %1967 = vmatpush3.bf16.msra.mxu0 %v2148_v28 }
 0x4bc   :  { %v947_v4 = vrot.slane %v946_v3, 1  ;;  %1968 = vmatprep.subr.bf16.mxu0 %v2830_v5  ;;  %v1205_v1 = vand.u32 127, %v1204_v0 }
 0x4be   :  { %v948_v6 = vadd.f32 %v947_v4, %v946_v3  ;;  %v1212_v3 = vld [vmem:[%s3326_s5] sm:$0xff]  ;;  %vm1206_vm2 = vcmp.lt.s32.totalorder %v1205_v1, 64 }
 0x4bf   :  { %1969 = vmatpush3.bf16.msra.mxu0 %v2149_v29 }
 0x4c0   :  { %v949_v7 = vmul.f32 0.125, %v948_v6  ;;  %1970 = vmatprep.subr.bf16.mxu0 %v2830_v5 }
 0x4c2   :  { %v950_v8 = vsub.f32 %v942_v61, %v949_v7 }
 0x4c3   :  { %1971 = vmatpush3.bf16.msra.mxu0 %v2150_v30 }
 0x4c4   :  { %v951_v9 = vmul.f32 %v950_v8, %v950_v8  ;;  %1972 = vmatprep.subr.bf16.mxu0 %v2830_v5 }
 0x4c6   :  { %v952_v10 = vrot.slane %v951_v9, 4 }
 0x4c7   :  { %1973 = vmatpush3.bf16.msra.mxu0 %v2151_v31 }
 0x4c8   :  { %v953_v11 = vadd.f32 %v952_v10, %v951_v9  ;;  %1974 = vmatprep.subr.bf16.mxu0 %v2830_v5 }
 0x4ca   :  { %v954_v12 = vrot.slane %v953_v11, 2 }
 0x4cb   :  { %1975 = vmatpush3.bf16.msra.mxu0 %v2152_v32 }
 0x4cc   :  { %v955_v13 = vadd.f32 %v954_v12, %v953_v11  ;;  %2000 = vmatprep.subr.bf16.mxu0 %v2830_v5  ;;  %v2161_v11 = vld [vmem:[#allocation29] sm:$0xff]   ;;  %v2162_v12 = vld [vmem:[#allocation29 + $0x8] sm:$0xff]  }
 0x4ce   :  { %v956_v14 = vrot.slane %v955_v13, 1 }
 0x4d0   :  { %v957_v15 = vadd.f32 %v956_v14, %v955_v13  ;;  %v2163_v13 = vld [vmem:[#allocation29 + $0x10] sm:$0xff]   ;;  %v2164_v14 = vld [vmem:[#allocation29 + $0x18] sm:$0xff]  }
 0x4d2   :  { %v958_v16 = vmul.f32 0.125, %v957_v15  ;;  %v2166_v15 = vld [vmem:[#allocation29 + $0x28] sm:$0xff]  }
 0x4d4   :  { %v959_v17 = vadd.f32 1e-05, %v958_v16  ;;  %v2167_v16 = vld [vmem:[#allocation29 + $0x30] sm:$0xff]  }
 0x4d6   :  { %2181 = vrsqrt.f32 %v959_v17  ;;  %v2168_v17 = vld [vmem:[#allocation29 + $0x38] sm:$0xff]  }
 0x4e0   :  { %v2182_v18 = vpop.eup %2181 }
 0x4e1   :  { %v961_v20 = vmul.f32 %v2182_v18, %v950_v8  ;;  %v1766_v18 = vld [vmem:[#allocation25] ss:$0 sm:$0xff] }
 0x4e3   :  { %v969_v22 = vmul.f32 %v1746_v19, %v961_v20 }
 0x4e5   :  { %v977_v23 = vadd.f32 %v1747_v21, %v969_v22 }
 0x4e7   :  { %v978_v24 = vpack.c.bf16 %v977_v23, %v977_v23 }
 0x4e9   :  { %1957 = vmatmul.mubr.bf16.vlgmr.msra.gmra.mrb[8].mxu1 %v978_v24 }
 0x4ea   :  { %1996 = vmatprep.mubr.msk.bf16.mxu1 %vm2831_vm0, %v2830_v5  ;;  %1981 = vmatpush3.bf16.msra.mxu1 %v2153_v47 }
 0x4eb   :  { %1982 = vmatprep.subr.bf16.mxu1 %v2830_v5 }
 0x4ee   :  { %1983 = vmatpush3.bf16.msra.mxu1 %v2154_v48 }
 0x4ef   :  { %1984 = vmatprep.subr.bf16.mxu1 %v2830_v5 }
 0x4f2   :  { %1985 = vmatpush3.bf16.msra.mxu1 %v2155_v49  ;;  %v2169_v49 = vld [vmem:[#allocation35] sm:$0xff]  }
 0x4f3   :  { %1986 = vmatprep.subr.bf16.mxu1 %v2830_v5 }
 0x4f6   :  { %1987 = vmatpush3.bf16.msra.mxu1 %v2156_v50  ;;  %v2170_v50 = vld [vmem:[#allocation35 + $0x8] sm:$0xff]  }
 0x4f7   :  { %1988 = vmatprep.subr.bf16.mxu1 %v2830_v5 }
 0x4fa   :  { %1989 = vmatpush3.bf16.msra.mxu1 %v2157_v51  ;;  %v2171_v51 = vld [vmem:[#allocation35 + $0x10] sm:$0xff]  }
 0x4fb   :  { %1990 = vmatprep.subr.bf16.mxu1 %v2830_v5 }
 0x4fe   :  { %1991 = vmatpush3.bf16.msra.mxu1 %v2158_v54  ;;  %v2174_v54 = vld [vmem:[#allocation35 + $0x28] sm:$0xff]  }
 0x4ff   :  { %1992 = vmatprep.subr.bf16.mxu1 %v2830_v5 }
 0x502   :  { %1993 = vmatpush3.bf16.msra.mxu1 %v2159_v59 }
 0x503   :  { %1994 = vmatprep.subr.bf16.mxu1 %v2830_v5 }
 0x506   :  { %1995 = vmatpush3.bf16.msra.mxu1 %v2160_v60 }
 0x507   :  { %2020 = vmatprep.subr.bf16.mxu1 %v2830_v5 }
 0x581   :  { %v866_v34 = vpop.f32.mrb[4].mxu0 }
 0x582   :  { %v867_v35 = vadd.f32 %v1733_v33, %v866_v34  ;;  %v1930_v36 = vpop.f32.mrb[5].mxu0 }
 0x583   :  { %v869_v37 = vpop.f32.mrb[6].mxu0 }
 0x584   :  { %872 = vst [vmem:[#allocation39] sm:$0xff] %v867_v35  ;;  %v1931_v38 = vpop.f32.mrb[7].mxu0 }
 0x5bc   :  { %v1084_v40 = vpop.f32.mrb[8].mxu1 }
 0x5bd   :  { %v1085_v41 = vadd.f32 %v1748_v39, %v1084_v40  ;;  %v1958_v42 = vpop.f32.mrb[9].mxu1 }
 0x5be   :  { %v1087_v43 = vpop.f32.mrb[10].mxu1 }
 0x5bf   :  { %v1090_v44 = vmax.f32 %v1085_v41, 0.0  ;;  %v1959_v45 = vpop.f32.mrb[11].mxu1  ;;  %v1775_v43 = vld [vmem:[#allocation26] ss:$0 sm:$0xff] }
 0x5c0   :  { %v1776_v45 = vld [vmem:[#allocation28] ss:$0 sm:$0xff] }
 0x5c1   :  { %v1091_v46 = vpack.c.bf16 %v1090_v44, %v1090_v44 }
 0x5c3   :  { %1977 = vmatmul.mubr.bf16.vlgmr.msra.gmra.mrb[8].mxu0 %v1091_v46 }
 0x5c4   :  { %2016 = vmatprep.mubr.msk.bf16.mxu0 %vm2831_vm0, %v2830_v5  ;;  %2001 = vmatpush3.bf16.msra.mxu0 %v2161_v11 }
 0x5c5   :  { %2002 = vmatprep.subr.bf16.mxu0 %v2830_v5 }
 0x5c8   :  { %2003 = vmatpush3.bf16.msra.mxu0 %v2162_v12 }
 0x5c9   :  { %2004 = vmatprep.subr.bf16.mxu0 %v2830_v5 }
 0x5cc   :  { %2005 = vmatpush3.bf16.msra.mxu0 %v2163_v13 }
 0x5cd   :  { %2006 = vmatprep.subr.bf16.mxu0 %v2830_v5 }
 0x5d0   :  { %2007 = vmatpush3.bf16.msra.mxu0 %v2164_v14 }
 0x5d1   :  { %2008 = vmatprep.subr.bf16.mxu0 %v2830_v5 }
 0x696   :  { %v1197_v53 = vpop.f32.mrb[8].mxu0 }
 0x697   :  { %v1198_v55 = vadd.f32 %v1757_v52, %v1197_v53  ;;  %v1978_v56 = vpop.f32.mrb[9].mxu0  ;;  %v2172_v52 = vld [vmem:[#allocation35 + $0x18] sm:$0xff]   ;;  %v2173_v53 = vld [vmem:[#allocation35 + $0x20] sm:$0xff]  }
 0x698   :  { %v1200_v57 = vpop.f32.mrb[10].mxu0  ;;  %v2176_v56 = vld [vmem:[#allocation35 + $0x38] sm:$0xff]  }
 0x699   :  { %1203 = vst [vmem:[%s3012_s25] sm:$0xff] %v1198_v55  ;;  %1210 = vrot.lane.b32.xlu1 %v1198_v55, %s2806_s28  ;;  %v1979_v58 = vpop.f32.mrb[11].mxu0  ;;  %v1209_v7 = vsel %vm1206_vm2, %v1198_v55, 0.0  ;;  %v2175_v55 = vld [vmem:[#allocation35 + $0x30] sm:$0xff]   ;;  %v1777_v57 = vld [vmem:[#allocation31] ss:$0 sm:$0xff]  ;;  %s2832_s25 = smov [#allocation39]  }
 0x69a   :  { %s1646_s28 = sshll.u32 %s2832_s25, 4  ;;  %s1647_s28 = int_to_ptr.vmem [resolvable:$true] %s1646_s28 }
 0x69b   :  { %s2695_s4 = scalar_lea.vmem %s1647_s28, 128  ;;  %p2700_p3 = scmp.lt.s32.totalorder %s1647_s28, %s1647_s28 }
 0x69c   :  { %p2696_p2 = scmp.ne.s32.totalorder %s1647_s28, %s2695_s4  ;;  %p2701_p4 = scmp.lt.s32.totalorder %s2695_s4, %s2695_s4 }
 0x69e   :  { %p2702_p5 = por %p2701_p4, %p2700_p3 }
 0x6a0   :  { %p2703_p6 = pnand %p2702_p5, %p2696_p2 }
 0x70b   :  { %v1211_v61 = vpop.permute.xlu1 %1210 }
 0x70c   :  { %v1213_v62 = vmul.f32 0.5, %v1211_v61 }
 0x70e   :  { %v1214_v63 = vmul.f32 1.442695, %v1213_v62 }
 0x710   :  { %2183 = vpow2.f32 %v1214_v63 }
 0x71a   :  { %v2184_v4 = vpop.eup %2183 }
 0x71b   :  { %v1216_v6 = vmul.f32 %v2184_v4, %v1212_v3 }
 0x71d   :  { %v1217_v8 = vadd.f32 %v1216_v6, %v1209_v7 }
 0x71f   :  { %v1218_v9 = vadd.f32 %v1217_v8, %v3141_v2  ;;  %v2165_v2 = vld [vmem:[#allocation29 + $0x20] sm:$0xff]  }
 0x720   :  { %2009 = vmatpush3.bf16.msra.mxu0 %v2165_v2 }
 0x721   :  { %v1219_v10 = vpack.c.bf16 %v1218_v9, %v1218_v9  ;;  %2010 = vmatprep.subr.bf16.mxu0 %v2830_v5 }
 0x723   :  { %1997 = vmatmul.mubr.bf16.vlgmr.msra.gmra.mrb[12].mxu1 %v1219_v10 }
 0x724   :  { %2036 = vmatprep.mubr.msk.bf16.mxu1 %vm2831_vm0, %v2830_v5  ;;  %2011 = vmatpush3.bf16.msra.mxu0 %v2166_v15 }
 0x725   :  { %2012 = vmatprep.subr.bf16.mxu0 %v2830_v5  ;;  %2021 = vmatpush3.bf16.msra.mxu1 %v2169_v49 }
 0x726   :  { %2022 = vmatprep.subr.bf16.mxu1 %v2830_v5 }
 0x728   :  { %2013 = vmatpush3.bf16.msra.mxu0 %v2167_v16 }
 0x729   :  { %2014 = vmatprep.subr.bf16.mxu0 %v2830_v5  ;;  %2023 = vmatpush3.bf16.msra.mxu1 %v2170_v50 }
 0x72a   :  { %2024 = vmatprep.subr.bf16.mxu1 %v2830_v5 }
 0x72c   :  { %2015 = vmatpush3.bf16.msra.mxu0 %v2168_v17 }
 0x72d   :  { %2025 = vmatpush3.bf16.msra.mxu1 %v2171_v51 }
 0x72e   :  { %2026 = vmatprep.subr.bf16.mxu1 %v2830_v5 }
 0x731   :  { %2027 = vmatpush3.bf16.msra.mxu1 %v2172_v52 }
 0x732   :  { %2028 = vmatprep.subr.bf16.mxu1 %v2830_v5 }
 0x735   :  { %2029 = vmatpush3.bf16.msra.mxu1 %v2173_v53 }
 0x736   :  { %2030 = vmatprep.subr.bf16.mxu1 %v2830_v5 }
 0x739   :  { %2031 = vmatpush3.bf16.msra.mxu1 %v2174_v54 }
 0x73a   :  { %2032 = vmatprep.subr.bf16.mxu1 %v2830_v5 }
 0x73d   :  { %2033 = vmatpush3.bf16.msra.mxu1 %v2175_v55 }
 0x73e   :  { %2034 = vmatprep.subr.bf16.mxu1 %v2830_v5 }
 0x741   :  { %2035 = vmatpush3.bf16.msra.mxu1 %v2176_v56 }
 0x7f6   :  { %v1325_v19 = vpop.f32.mrb[12].mxu1 }
 0x7f7   :  { %v1326_v20 = vadd.f32 %v1766_v18, %v1325_v19  ;;  %v1998_v21 = vpop.f32.mrb[13].mxu1  ;;  %v1786_v18 = vld [vmem:[#allocation32] ss:$0 sm:$0xff] }
 0x7f8   :  { %v1328_v22 = vpop.f32.mrb[14].mxu1 }
 0x7f9   :  { %v1331_v23 = vmax.f32 %v1326_v20, 0.0  ;;  %v1999_v24 = vpop.f32.mrb[15].mxu1  ;;  %v1787_v20 = vld [vmem:[#allocation34] ss:$0 sm:$0xff] }
 0x7fb   :  { %v1332_v25 = vrot.slane %v1331_v23, 4 }
 0x7fd   :  { %v1333_v26 = vadd.f32 %v1332_v25, %v1331_v23 }
 0x7ff   :  { %v1334_v27 = vrot.slane %v1333_v26, 2 }
 0x801   :  { %v1335_v28 = vadd.f32 %v1334_v27, %v1333_v26 }
 0x803   :  { %v1336_v29 = vrot.slane %v1335_v28, 1 }
 0x805   :  { %v1337_v30 = vadd.f32 %v1336_v29, %v1335_v28 }
 0x807   :  { %v1338_v31 = vmul.f32 0.125, %v1337_v30 }
 0x809   :  { %v1339_v32 = vsub.f32 %v1331_v23, %v1338_v31 }
 0x80b   :  { %v1340_v33 = vmul.f32 %v1339_v32, %v1339_v32 }
 0x80d   :  { %v1341_v34 = vrot.slane %v1340_v33, 4 }
 0x80f   :  { %v1342_v35 = vadd.f32 %v1341_v34, %v1340_v33 }
 0x811   :  { %v1343_v36 = vrot.slane %v1342_v35, 2 }
 0x813   :  { %v1344_v37 = vadd.f32 %v1343_v36, %v1342_v35 }
 0x815   :  { %v1345_v38 = vrot.slane %v1344_v37, 1 }
 0x817   :  { %v1346_v39 = vadd.f32 %v1345_v38, %v1344_v37 }
 0x819   :  { %v1347_v40 = vmul.f32 0.125, %v1346_v39 }
 0x81b   :  { %v1348_v41 = vadd.f32 1e-05, %v1347_v40 }
 0x81d   :  { %2185 = vrsqrt.f32 %v1348_v41 }
 0x827   :  { %v2186_v42 = vpop.eup %2185 }
 0x828   :  { %v1350_v44 = vmul.f32 %v2186_v42, %v1339_v32 }
 0x82a   :  { %v1358_v46 = vmul.f32 %v1775_v43, %v1350_v44 }
 0x82c   :  { %v1366_v47 = vadd.f32 %v1776_v45, %v1358_v46 }
 0x82e   :  { %v1367_v48 = vpack.c.bf16 %v1366_v47, %v1366_v47 }
 0x830   :  { %2017 = vmatmul.mubr.bf16.vlgmr.msra.gmra.mrb[12].mxu0 %v1367_v48 }
 0x903   :  { %v1473_v58 = vpop.f32.mrb[12].mxu0 }
 0x904   :  { %v1474_v59 = vadd.f32 %v1777_v57, %v1473_v58  ;;  %v2018_v60 = vpop.f32.mrb[13].mxu0 }
 0x905   :  { %v1476_v61 = vpop.f32.mrb[14].mxu0 }
 0x906   :  { %v1479_v62 = vmax.f32 %v1474_v59, 0.0  ;;  %v2019_v63 = vpop.f32.mrb[15].mxu0 }
 0x908   :  { %v1480_v0 = vrot.slane %v1479_v62, 4 }
 0x90a   :  { %v1481_v1 = vadd.f32 %v1480_v0, %v1479_v62 }
 0x90c   :  { %v1482_v3 = vrot.slane %v1481_v1, 2 }
 0x90e   :  { %v1483_v4 = vadd.f32 %v1482_v3, %v1481_v1 }
 0x910   :  { %v1484_v6 = vrot.slane %v1483_v4, 1 }
 0x912   :  { %v1485_v7 = vadd.f32 %v1484_v6, %v1483_v4 }
 0x914   :  { %v1486_v8 = vmul.f32 0.125, %v1485_v7 }
 0x916   :  { %v1487_v9 = vsub.f32 %v1479_v62, %v1486_v8 }
 0x918   :  { %v1488_v10 = vmul.f32 %v1487_v9, %v1487_v9 }
 0x91a   :  { %v1489_v11 = vrot.slane %v1488_v10, 4 }
 0x91c   :  { %v1490_v5 = vadd.f32 %v1489_v11, %v1488_v10 }
 0x91e   :  { %v1491_v12 = vrot.slane %v1490_v5, 2 }
 0x920   :  { %v1492_v13 = vadd.f32 %v1491_v12, %v1490_v5 }
 0x922   :  { %v1493_v14 = vrot.slane %v1492_v13, 1 }
 0x924   :  { %v1494_v2 = vadd.f32 %v1493_v14, %v1492_v13 }
 0x926   :  { %v1495_v15 = vmul.f32 0.125, %v1494_v2 }
 0x928   :  { %v1496_v16 = vadd.f32 1e-05, %v1495_v15 }
 0x92a   :  { %2187 = vrsqrt.f32 %v1496_v16 }
 0x934   :  { %v2188_v17 = vpop.eup %2187 }
 0x935   :  { %v1498_v19 = vmul.f32 %v2188_v17, %v1487_v9 }
 0x937   :  { %v1506_v21 = vmul.f32 %v1786_v18, %v1498_v19 }
 0x939   :  { %v1514_v22 = vadd.f32 %v1787_v20, %v1506_v21 }
 0x93b   :  { %v1515_v23 = vpack.c.bf16 %v1514_v22, %v1514_v22 }
 0x93d   :  { %2037 = vmatmul.mubr.bf16.vlgmr.msra.gmra.mrb[16].mxu1 %v1515_v23 }
 0x93e   :  { %2706 = shalt.err (!%p2703_p6)
}
 0x93f   :  { %s2707_s18 = scalar_lea.hbm %s3017_s12, 128 }
 0x940   :  { %p2708_p7 = scmp.ne.s32.totalorder %s3017_s12, %s2707_s18  ;;  %p2711_p8 = scmp.lt.u32.totalorder %s2707_s18, %s3017_s12 }
 0x942   :  { %p2713_p9 = pnand %p2711_p8, %p2708_p7 }
 0x944   :  { %2716 = shalt.err (!%p2713_p9)
}
 0x945   :  { %1649 = dma.vmem_to_hbm [thread:$0]  %s1647_s28, 128, %s3017_s12, [#allocation40]   ;;  %v1788_v24 = vld [vmem:[#allocation37] ss:$0 sm:$0xff] }
 0x946   :  { %s2833_s22 = smov [#allocation38]  }
 0x947   :  { %s1634_s0 = sshll.u32 %s2833_s22, 4  ;;  %s1635_s0 = int_to_ptr.vmem [resolvable:$true] %s1634_s0 }
 0x948   :  { %s2717_s6 = scalar_lea.vmem %s1635_s0, 128  ;;  %p2722_p11 = scmp.lt.s32.totalorder %s1635_s0, %s1635_s0 }
 0x949   :  { %p2718_p10 = scmp.ne.s32.totalorder %s1635_s0, %s2717_s6  ;;  %p2723_p12 = scmp.lt.s32.totalorder %s2717_s6, %s2717_s6 }
 0x94b   :  { %p2724_p13 = por %p2723_p12, %p2722_p11 }
 0x94d   :  { %p2725_p0 = pnand %p2724_p13, %p2718_p10 }
 0xa10   :  { %v1621_v25 = vpop.f32.mrb[16].mxu1 }
 0xa11   :  { %v1622_v26 = vadd.f32 %v1788_v24, %v1621_v25  ;;  %v2038_v27 = vpop.f32.mrb[17].mxu1 }
 0xa12   :  { %v1624_v28 = vpop.f32.mrb[18].mxu1 }
 0xa13   :  { %1627 = vst [vmem:[#allocation38] sm:$0xff] %v1622_v26  ;;  %v2039_v29 = vpop.f32.mrb[19].mxu1 }
 0xa14   :  { %2728 = shalt.err (!%p2725_p0)
}
 0xa15   :  { %s2729_s12 = scalar_lea.hbm %s3007_s27, 128 }
 0xa16   :  { %p2730_p1 = scmp.ne.s32.totalorder %s3007_s27, %s2729_s12  ;;  %p2733_p2 = scmp.lt.u32.totalorder %s2729_s12, %s3007_s27 }
 0xa18   :  { %p2735_p3 = pnand %p2733_p2, %p2730_p1 }
 0xa1a   :  { %2738 = shalt.err (!%p2735_p3)
}
 0xa1b   :  { %1637 = dma.vmem_to_hbm [thread:$0]  %s1635_s0, 128, %s3007_s27, [#allocation4]  }
 0xa1c   :  { %2763 = dma.done.wait [#allocation4], 128  }
 0xa1d   :  { %2764 = vsyncadd [#allocation4], 4294967168 }
 0xa1e   :  { %2765 = dma.done.wait [#allocation40], 128  }
 0xa1f   :  { %2766 = vsyncadd [#allocation40], 4294967168 }
 0xa20   :  { %1658 = vsyncpa [#allocation3], 1 }
 0xa21   :  { %1659 = vsyncpa [#allocation6], 1 }
 0xa22   :  { %1660 = vsyncpa [#allocation9], 1 }
 0xa23   :  { %1661 = vsyncpa [#allocation12], 1 }
 0xa24   :  { %1662 = vsyncpa [#allocation15], 1 }
 0xa25   :  { %1663 = vsyncpa [#allocation18], 1 }
 0xa26   :  { %1664 = vsyncpa [#allocation21], 1 }
 0xa27   :  { %1665 = vsyncpa [#allocation24], 1 }
 0xa28   :  { %1666 = vsyncpa [#allocation27], 1 }
 0xa29   :  { %1667 = vsyncpa [#allocation30], 1 }
 0xa2a   :  { %1668 = vsyncpa [#allocation33], 1 }
 0xa2b   :  { %1669 = vsyncpa [#allocation36], 1 }
 0xa2c   :  { %1670 = vsyncpa [#allocation4], 1 }
 0xa2d   :  { %1671 = vsyncpa [#allocation40], 1 }

</bundles_post_ra>
